<compile_context>
chip_gen: v7x
topology: tpu7x:2x2x1
jax: 0.10.0
libtpu: 0.0.40
codegen_flags: <defaults>
</compile_context>

<pallas_src>
import functools

import jax
import jax.numpy as jnp
from jax import lax
from jax.experimental import pallas as pl
from jax.experimental.pallas import tpu as pltpu

EPS = 1e-5
LANE = 128
VMEM_LIMIT = 32 * 1024 * 1024  # safe scoped-VMEM budget on v5e / v6e / v7x


def _rup(x, m):
    return (x + m - 1) // m * m


def _pad2d(a, rows, cols):
    return jnp.pad(a, ((0, rows - a.shape[0]), (0, cols - a.shape[1])))


def _pick_tm(m, streamed_cols, budget_bytes=12 * 1024 * 1024, max_tm=1024):
    """Rows per M-tile. Streamed f32 blocks are double-buffered (8 B/row/col)."""
    per_row = 8 * max(streamed_cols, 1)
    tm = min(max_tm, max(128, budget_bytes // per_row))
    tm = max(128, (tm // 128) * 128)
    return min(tm, _rup(m, 128))


def _compiler_params():
    return pltpu.CompilerParams(dimension_semantics=("parallel",),
                                vmem_limit_bytes=VMEM_LIMIT)


# ----------------------------------------------------------------------------
# Kernels
# ----------------------------------------------------------------------------
def _gemm_stats_kernel(x_ref, w_ref, y_ref, st_ref):
    """y = x @ w on the MXU; emit y tile + per-tile channel (sum, sum_sq)."""
    y = jnp.dot(x_ref[...], w_ref[...], preferred_element_type=jnp.float32)
    y_ref[...] = y
    st_ref[...] = jnp.concatenate(
        [jnp.sum(y, axis=0, keepdims=True),
         jnp.sum(y * y, axis=0, keepdims=True)], axis=0)[None]


def _affine_gemm_stats_kernel(z_ref, sc_ref, sh_ref, w_ref, y_ref, st_ref,
                              *, valid_rows, tm):
    """a = relu(z*scale+shift) (previous BN affine fused); y = a @ w; emit stats."""
    a = jnp.maximum(z_ref[...] * sc_ref[...] + sh_ref[...], 0.0)
    if valid_rows is not None:
        # Zero rows that only exist because M was padded up to a tile multiple,
        # so they do not pollute the next layer's batch statistics.
        row = pl.program_id(0) * tm + lax.broadcasted_iota(jnp.int32, a.shape, 0)
        a = jnp.where(row < valid_rows, a, 0.0)
    y = jnp.dot(a, w_ref[...], preferred_element_type=jnp.float32)
    y_ref[...] = y
    st_ref[...] = jnp.concatenate(
        [jnp.sum(y, axis=0, keepdims=True),
         jnp.sum(y * y, axis=0, keepdims=True)], axis=0)[None]


def _conv3x3_stats_kernel(zp_ref, sc_ref, sh_ref, w_ref, y_ref, st_ref, *, h, w):
    """Direct 3x3 conv (stride 1, pad 1) on one image block.

    BN1 affine + ReLU is applied in-kernel to the pre-BN input; the spatial halo
    is masked back to zero (conv padding applies to the post-activation map).
    The conv itself is 9 accumulated GEMMs over shifted windows: no im2col.
    """
    zp = zp_ref[0]                                             # [h+2, w+2, cin]
    sc = sc_ref[...].reshape(1, 1, -1)
    sh = sh_ref[...].reshape(1, 1, -1)
    a = jnp.maximum(zp * sc + sh, 0.0)

    row = lax.broadcasted_iota(jnp.int32, (h + 2, w + 2, 1), 0)
    col = lax.broadcasted_iota(jnp.int32, (h + 2, w + 2, 1), 1)
    interior = (row >= 1) & (row <= h) & (col >= 1) & (col <= w)
    a = jnp.where(interior, a, 0.0)

    cin = zp.shape[-1]
    cout = w_ref.shape[-1]
    acc = jnp.zeros((h * w, cout), jnp.float32)
    for kh in range(3):
        for kw in range(3):
            patch = a[kh:kh + h, kw:kw + w, :].reshape(h * w, cin)
            acc = acc + jnp.dot(patch, w_ref[kh * 3 + kw],
                                preferred_element_type=jnp.float32)
    y_ref[0] = acc
    st_ref[...] = jnp.concatenate(
        [jnp.sum(acc, axis=0, keepdims=True),
         jnp.sum(acc * acc, axis=0, keepdims=True)], axis=0)[None]


def _affine_res_relu_kernel(z_ref, sc_ref, sh_ref, r_ref, o_ref):
    """out = relu(z*scale + shift + residual)."""
    o_ref[...] = jnp.maximum(
        z_ref[...] * sc_ref[...] + sh_ref[...] + r_ref[...], 0.0)


# ----------------------------------------------------------------------------
# pallas_call wrappers
# ----------------------------------------------------------------------------
def gemm_stats(x, w, tm):
    mp, k = x.shape
    c = w.shape[1]
    g = mp // tm
    return pl.pallas_call(
        _gemm_stats_kernel,
        out_shape=(jax.ShapeDtypeStruct((mp, c), jnp.float32),
                   jax.ShapeDtypeStruct((g, 2, c), jnp.float32)),
        grid=(g,),
        in_specs=[pl.BlockSpec((tm, k), lambda i: (i, 0)),
                  pl.BlockSpec((k, c), lambda i: (0, 0))],     # resident weight
        out_specs=(pl.BlockSpec((tm, c), lambda i: (i, 0)),
                   pl.BlockSpec((1, 2, c), lambda i: (i, 0, 0))),
        compiler_params=_compiler_params(),
    )(x, w)


def affine_gemm_stats(z, scale, shift, w, valid_rows, tm):
    mp, k = z.shape
    c = w.shape[1]
    g = mp // tm
    kern = functools.partial(
        _affine_gemm_stats_kernel,
        valid_rows=None if mp == valid_rows else valid_rows, tm=tm)
    return pl.pallas_call(
        kern,
        out_shape=(jax.ShapeDtypeStruct((mp, c), jnp.float32),
                   jax.ShapeDtypeStruct((g, 2, c), jnp.float32)),
        grid=(g,),
        in_specs=[pl.BlockSpec((tm, k), lambda i: (i, 0)),
                  pl.BlockSpec((1, k), lambda i: (0, 0)),
                  pl.BlockSpec((1, k), lambda i: (0, 0)),
                  pl.BlockSpec((k, c), lambda i: (0, 0))],
        out_specs=(pl.BlockSpec((tm, c), lambda i: (i, 0)),
                   pl.BlockSpec((1, 2, c), lambda i: (i, 0, 0))),
        compiler_params=_compiler_params(),
    )(z, scale, shift, w)


def conv3x3_stats(z_halo, scale, shift, w2, h, w):
    # TODO(synk): for very large spatial extents, tile H with manual halo DMAs
    # (P4) instead of one full image per grid step.
    n = z_halo.shape[0]
    cin = z_halo.shape[-1]
    cout = w2.shape[-1]
    kern = functools.partial(_conv3x3_stats_kernel, h=h, w=w)
    return pl.pallas_call(
        kern,
        out_shape=(jax.ShapeDtypeStruct((n, h * w, cout), jnp.float32),
                   jax.ShapeDtypeStruct((n, 2, cout), jnp.float32)),
        grid=(n,),
        in_specs=[pl.BlockSpec((1, h + 2, w + 2, cin), lambda i: (i, 0, 0, 0)),
                  pl.BlockSpec((1, cin), lambda i: (0, 0)),
                  pl.BlockSpec((1, cin), lambda i: (0, 0)),
                  pl.BlockSpec((9, cin, cout), lambda i: (0, 0, 0))],
        out_specs=(pl.BlockSpec((1, h * w, cout), lambda i: (i, 0, 0)),
                   pl.BlockSpec((1, 2, cout), lambda i: (i, 0, 0))),
        compiler_params=_compiler_params(),
    )(z_halo, scale, shift, w2)


def affine_res_relu(z, scale, shift, residual, tm):
    mp, c = z.shape
    g = mp // tm
    return pl.pallas_call(
        _affine_res_relu_kernel,
        out_shape=jax.ShapeDtypeStruct((mp, c), jnp.float32),
        grid=(g,),
        in_specs=[pl.BlockSpec((tm, c), lambda i: (i, 0)),
                  pl.BlockSpec((1, c), lambda i: (0, 0)),
                  pl.BlockSpec((1, c), lambda i: (0, 0)),
                  pl.BlockSpec((tm, c), lambda i: (i, 0))],
        out_specs=pl.BlockSpec((tm, c), lambda i: (i, 0)),
        compiler_params=_compiler_params(),
    )(z, scale, shift, residual)


# ----------------------------------------------------------------------------
# BatchNorm finalize (tiny per-channel fold, plain XLA glue)
# ----------------------------------------------------------------------------
def _bn_scale_shift(stats, gamma, beta, m, eps=EPS):
    """stats: [G, 2, C] partial (sum, sum_sq). Training-mode BN, biased variance."""
    s = jnp.sum(stats[:, 0, :], axis=0)
    sq = jnp.sum(stats[:, 1, :], axis=0)
    mean = s / m
    var = jnp.maximum(sq / m - mean * mean, 0.0)
    scale = gamma[0] * lax.rsqrt(var + eps)
    shift = beta[0] - mean * scale
    return scale[None, :], shift[None, :]


# ----------------------------------------------------------------------------
# ResBlock forward
# ----------------------------------------------------------------------------
def resblock_forward(x_nchw, params, num_layers=50, stride=1):
    """Forward pass of ResBlock. x_nchw: [N, Cin, H, W] f32. Returns NCHW."""
    assert num_layers > 34, "this script implements the bottleneck (num_layers>34) path"
    assert stride == 1, "stride=1 / identity_downsample=None path"
    # TODO(synk): identity_downsample submodule (arbitrary nn.Sequential) not modeled.

    n, cin, h, w = x_nchw.shape
    cmid = params["w1"].shape[1]
    cexp = params["w3"].shape[1]
    assert cin == cexp, "residual add requires in_channels == out_channels*expansion"

    cin_p, cmid_p, cexp_p = _rup(cin, LANE), _rup(cmid, LANE), _rup(cexp, LANE)
    m = n * h * w
    tm = _pick_tm(m, cin_p + cmid_p + 3 * cexp_p)
    mp = _rup(m, tm)

    # Lane-dense, M-padded buffers (zero padding keeps BN sums exact).
    x2d = jnp.transpose(x_nchw, (0, 2, 3, 1)).reshape(m, cin)
    xp = _pad2d(x2d, mp, cin_p)
    identity = xp if cin_p == cexp_p else _pad2d(x2d, mp, cexp_p)

    w1p = _pad2d(params["w1"], cin_p, cmid_p)
    w3p = _pad2d(params["w3"], cmid_p, cexp_p)
    w2p = jnp.pad(params["w2"],
                  ((0, 0), (0, 0), (0, cmid_p - cmid), (0, cmid_p - cmid)))
    w2p = w2p.reshape(9, cmid_p, cmid_p)
    g1 = _pad2d(params["g1"], 1, cmid_p); be1 = _pad2d(params["be1"], 1, cmid_p)
    g2 = _pad2d(params["g2"], 1, cmid_p); be2 = _pad2d(params["be2"], 1, cmid_p)
    g3 = _pad2d(params["g3"], 1, cexp_p); be3 = _pad2d(params["be3"], 1, cexp_p)

    # conv1 (1x1) + BN1 stats.  (Conv bias cancels under training-mode BN.)
    z1_pre, st1 = gemm_stats(xp, w1p, tm)
    sc1, sh1 = _bn_scale_shift(st1, g1, be1, m)

    # conv2 (3x3, pad=1): BN1 affine + ReLU fused in-kernel, halo masked to 0.
    z1_img = z1_pre[:m].reshape(n, h, w, cmid_p)
    z1_halo = jnp.pad(z1_img, ((0, 0), (1, 1), (1, 1), (0, 0)))
    z2_pre, st2 = conv3x3_stats(z1_halo, sc1, sh1, w2p, h, w)
    sc2, sh2 = _bn_scale_shift(st2, g2, be2, m)

    # conv3 (1x1): BN2 affine + ReLU + GEMM + BN3 stats, fused.
    z2p = jnp.pad(z2_pre.reshape(m, cmid_p), ((0, mp - m), (0, 0)))
    z3_pre, st3 = affine_gemm_stats(z2p, sc2, sh2, w3p, m, tm)
    sc3, sh3 = _bn_scale_shift(st3, g3, be3, m)

    # BN3 affine + residual add + ReLU.
    out2d = affine_res_relu(z3_pre, sc3, sh3, identity, tm)
    out = out2d[:m, :cexp].reshape(n, h, w, cexp)
    return jnp.transpose(out, (0, 3, 1, 2))


# ----------------------------------------------------------------------------
# Synthetic parameters + pure-JAX reference
# ----------------------------------------------------------------------------
def make_params(key, in_channels, out_channels, expansion):
    """Deterministic synthetic parameters (shapes follow the nn.Module __init__)."""
    c_exp = out_channels * expansion
    ks = jax.random.split(key, 9)

    def bn(k, c):
        kg, kb = jax.random.split(k)
        return (1.0 + 0.1 * jax.random.normal(kg, (1, c), jnp.float32),
                0.1 * jax.random.normal(kb, (1, c), jnp.float32))

    p = {}
    p["w1"] = 0.1 * jax.random.normal(ks[0], (in_channels, out_channels), jnp.float32)
    p["b1"] = 0.1 * jax.random.normal(ks[1], (1, out_channels), jnp.float32)
    p["g1"], p["be1"] = bn(ks[2], out_channels)
    p["w2"] = 0.1 * jax.random.normal(ks[3], (3, 3, out_channels, out_channels), jnp.float32)
    p["b2"] = 0.1 * jax.random.normal(ks[4], (1, out_channels), jnp.float32)
    p["g2"], p["be2"] = bn(ks[5], out_channels)
    p["w3"] = 0.1 * jax.random.normal(ks[6], (out_channels, c_exp), jnp.float32)
    p["b3"] = 0.1 * jax.random.normal(ks[7], (1, c_exp), jnp.float32)
    p["g3"], p["be3"] = bn(ks[8], c_exp)
    return p


def _reference_forward(x_nchw, params):
    """Pure-JAX reference (conv biases included; they cancel under training-mode BN)."""
    def bn_relu(y, g, b, res=None):
        mu = jnp.mean(y, axis=0, keepdims=True)
        var = jnp.mean(jnp.square(y - mu), axis=0, keepdims=True)
        y = (y - mu) * lax.rsqrt(var + EPS) * g + b
        if res is not None:
            y = y + res
        return jnp.maximum(y, 0.0)

    n, cin, h, w = x_nchw.shape
    x = jnp.transpose(x_nchw, (0, 2, 3, 1))
    m = n * h * w
    ident = x.reshape(m, cin)
    z1 = bn_relu(x.reshape(m, cin) @ params["w1"] + params["b1"],
                 params["g1"], params["be1"])
    cmid = z1.shape[1]
    xp = jnp.pad(z1.reshape(n, h, w, cmid), ((0, 0), (1, 1), (1, 1), (0, 0)))
    taps = [xp[:, kh:kh + h, kw:kw + w, :] for kh in range(3) for kw in range(3)]
    patches = jnp.concatenate(taps, axis=-1).reshape(m, 9 * cmid)
    w2 = params["w2"].reshape(9 * cmid, cmid)
    z2 = bn_relu(patches @ w2 + params["b2"], params["g2"], params["be2"])
    z3 = bn_relu(z2 @ params["w3"] + params["b3"], params["g3"], params["be3"],
                 res=ident)
    return jnp.transpose(z3.reshape(n, h, w, z3.shape[1]), (0, 3, 1, 2))


if __name__ == "__main__":
    # num_layers=50 -> expansion=4; residual add requires in_channels = out_channels*4.
    num_layers = 50
    out_channels = 4
    expansion = 4
    in_channels = out_channels * expansion              # 16
    N, H, W = 2, 8, 8

    key = jax.random.PRNGKey(0)
    kx, kp = jax.random.split(key)
    x = jax.random.normal(kx, (N, in_channels, H, W), jnp.float32)
    params = make_params(kp, in_channels, out_channels, expansion)

    fwd = jax.jit(resblock_forward)
    out = jax.block_until_ready(fwd(x, params))

    ref = jax.block_until_ready(_reference_forward(x, params))
    assert out.shape == (N, out_channels * expansion, H, W)
    assert jnp.allclose(out, ref, atol=1e-4, rtol=1e-4), float(jnp.abs(out - ref).max())

    print("KERNEL_OK")
</pallas_src>

<mosaic_0001>
module attributes {stable_mosaic.version = 11 : i64} {
  func.func @_gemm_stats_kernel(%arg0: i32, %arg1: memref<128x128xf32, #tpu.memory_space<vmem>>, %arg2: memref<128x128xf32, #tpu.memory_space<vmem>>, %arg3: memref<128x128xf32, #tpu.memory_space<vmem>>, %arg4: memref<1x2x128xf32, #tpu.memory_space<vmem>>) attributes {dimension_semantics = [#tpu.dimension_semantics<parallel>], iteration_bounds = array<i64: 1>, scalar_prefetch = 0 : i64, scratch_operands = 0 : i64, tpu.core_type = #tpu.core_type<tc>, window_params = [{transform_indices = @transform_0, window_bounds = array<i64: 128, 128>}, {pipeline_mode = #tpu.pipeline_mode<synchronous>, transform_indices = @transform_1, window_bounds = array<i64: 128, 128>}, {transform_indices = @transform_2, window_bounds = array<i64: 128, 128>}, {transform_indices = @transform_3, window_bounds = array<i64: 1, 2, 128>}]} {
    %c0 = arith.constant 0 : index
    %c0_0 = arith.constant 0 : index
    %0 = vector.load %arg1[%c0, %c0_0] : memref<128x128xf32, #tpu.memory_space<vmem>>, vector<128x128xf32>
    %c0_1 = arith.constant 0 : index
    %c0_2 = arith.constant 0 : index
    %1 = vector.load %arg2[%c0_1, %c0_2] : memref<128x128xf32, #tpu.memory_space<vmem>>, vector<128x128xf32>
    %cst = arith.constant dense<0.000000e+00> : vector<128x128xf32>
    %2 = tpu.matmul %0, %1, %cst {dimension_numbers = #tpu.dot_dimension_numbers<[1], [0], [0], [1], [0, 0, 1, 1], [], []>} : vector<128x128xf32>, vector<128x128xf32>, vector<128x128xf32> -> vector<128x128xf32>
    %c0_3 = arith.constant 0 : index
    %c0_4 = arith.constant 0 : index
    %3 = vector.load %arg3[%c0_3, %c0_4] : memref<128x128xf32, #tpu.memory_space<vmem>>, vector<128x128xf32>
    tpu.vector_store %arg3[%c0_3, %c0_4], %2 {strides = array<i32>} : memref<128x128xf32, #tpu.memory_space<vmem>>, vector<128x128xf32>,
    %cst_5 = arith.constant dense<0.000000e+00> : vector<128xf32>
    %4 = vector.multi_reduction <add>, %2, %cst_5 [0] : vector<128x128xf32> to vector<128xf32>
    %5 = vector.shape_cast %4 : vector<128xf32> to vector<1x128xf32>
    %6 = arith.mulf %2, %2 : vector<128x128xf32>
    %cst_6 = arith.constant dense<0.000000e+00> : vector<128xf32>
    %7 = vector.multi_reduction <add>, %6, %cst_6 [0] : vector<128x128xf32> to vector<128xf32>
    %8 = vector.shape_cast %7 : vector<128xf32> to vector<1x128xf32>
    %9 = tpu.concatenate %5, %8 in 0 : vector<1x128xf32>, vector<1x128xf32> -> vector<2x128xf32>
    %10 = vector.shape_cast %9 : vector<2x128xf32> to vector<1x2x128xf32>
    %c0_7 = arith.constant 0 : index
    %c0_8 = arith.constant 0 : index
    %c0_9 = arith.constant 0 : index
    %11 = vector.load %arg4[%c0_7, %c0_8, %c0_9] : memref<1x2x128xf32, #tpu.memory_space<vmem>>, vector<1x2x128xf32>
    tpu.vector_store %arg4[%c0_7, %c0_8, %c0_9], %10 {strides = array<i32>} : memref<1x2x128xf32, #tpu.memory_space<vmem>>, vector<1x2x128xf32>,
    return
  }
  func.func @transform_0(%arg0: i32) -> (i32, i32) {
    %c0_i32 = arith.constant 0 : i32
    %c0_i32_0 = arith.constant 0 : i32
    return %arg0, %c0_i32 : i32, i32
  }
  func.func @transform_1(%arg0: i32) -> (i32, i32) {
    %c0_i32 = arith.constant 0 : i32
    %c0_i32_0 = arith.constant 0 : i32
    %c0_i32_1 = arith.constant 0 : i32
    return %c0_i32, %c0_i32_0 : i32, i32
  }
  func.func @transform_2(%arg0: i32) -> (i32, i32) {
    %c0_i32 = arith.constant 0 : i32
    %c0_i32_0 = arith.constant 0 : i32
    return %arg0, %c0_i32 : i32, i32
  }
  func.func @transform_3(%arg0: i32) -> (i32, i32, i32) {
    %c0_i32 = arith.constant 0 : i32
    %c0_i32_0 = arith.constant 0 : i32
    %c0_i32_1 = arith.constant 0 : i32
    return %arg0, %c0_i32, %c0_i32_0 : i32, i32, i32
  }
}

module attributes {stable_mosaic.version = 11 : i64} {
  func.func @_conv3x3_stats_kernel(%arg0: i32, %arg1: memref<1x10x10x128xf32, #tpu.memory_space<vmem>>, %arg2: memref<1x128xf32, #tpu.memory_space<vmem>>, %arg3: memref<1x128xf32, #tpu.memory_space<vmem>>, %arg4: memref<9x128x128xf32, #tpu.memory_space<vmem>>, %arg5: memref<1x64x128xf32, #tpu.memory_space<vmem>>, %arg6: memref<1x2x128xf32, #tpu.memory_space<vmem>>) attributes {dimension_semantics = [#tpu.dimension_semantics<parallel>], iteration_bounds = array<i64: 2>, scalar_prefetch = 0 : i64, scratch_operands = 0 : i64, tpu.core_type = #tpu.core_type<tc>, window_params = [{transform_indices = @transform_0, window_bounds = array<i64: 1, 10, 10, 128>}, {pipeline_mode = #tpu.pipeline_mode<synchronous>, transform_indices = @transform_1, window_bounds = array<i64: 1, 128>}, {pipeline_mode = #tpu.pipeline_mode<synchronous>, transform_indices = @transform_2, window_bounds = array<i64: 1, 128>}, {pipeline_mode = #tpu.pipeline_mode<synchronous>, transform_indices = @transform_3, window_bounds = array<i64: 9, 128, 128>}, {transform_indices = @transform_4, window_bounds = array<i64: 1, 64, 128>}, {transform_indices = @transform_5, window_bounds = array<i64: 1, 2, 128>}]} {
    %c0 = arith.constant 0 : index
    %c0_0 = arith.constant 0 : index
    %c0_1 = arith.constant 0 : index
    %c0_2 = arith.constant 0 : index
    %0 = vector.load %arg1[%c0, %c0_0, %c0_1, %c0_2] : memref<1x10x10x128xf32, #tpu.memory_space<vmem>>, vector<1x10x10x128xf32>
    %1 = vector.shape_cast %0 : vector<1x10x10x128xf32> to vector<10x10x128xf32>
    %c0_3 = arith.constant 0 : index
    %c0_4 = arith.constant 0 : index
    %2 = vector.load %arg2[%c0_3, %c0_4] : memref<1x128xf32, #tpu.memory_space<vmem>>, vector<1x128xf32>
    %3 = vector.shape_cast %2 : vector<1x128xf32> to vector<1x1x128xf32>
    %c0_5 = arith.constant 0 : index
    %c0_6 = arith.constant 0 : index
    %4 = vector.load %arg3[%c0_5, %c0_6] : memref<1x128xf32, #tpu.memory_space<vmem>>, vector<1x128xf32>
    %5 = vector.shape_cast %4 : vector<1x128xf32> to vector<1x1x128xf32>
    %6 = vector.broadcast %3 : vector<1x1x128xf32> to vector<10x10x128xf32>
    %7 = arith.mulf %1, %6 : vector<10x10x128xf32>
    %8 = vector.broadcast %5 : vector<1x1x128xf32> to vector<10x10x128xf32>
    %9 = arith.addf %7, %8 : vector<10x10x128xf32>
    %cst = arith.constant 0.000000e+00 : f32
    %10 = vector.broadcast %cst : f32 to vector<10x10x128xf32>
    %11 = arith.maximumf %9, %10 : vector<10x10x128xf32>
    %12 = tpu.iota {dimensions = array<i32: 0>} : vector<10x10x1xi32>
    %13 = tpu.iota {dimensions = array<i32: 1>} : vector<10x10x1xi32>
    %c1_i32 = arith.constant 1 : i32
    %14 = vector.broadcast %c1_i32 : i32 to vector<10x10x1xi32>
    %15 = arith.cmpi sge, %12, %14 : vector<10x10x1xi32>
    %c8_i32 = arith.constant 8 : i32
    %16 = vector.broadcast %c8_i32 : i32 to vector<10x10x1xi32>
    %17 = arith.cmpi sle, %12, %16 : vector<10x10x1xi32>
    %18 = arith.andi %15, %17 : vector<10x10x1xi1>
    %c1_i32_7 = arith.constant 1 : i32
    %19 = vector.broadcast %c1_i32_7 : i32 to vector<10x10x1xi32>
    %20 = arith.cmpi sge, %13, %19 : vector<10x10x1xi32>
    %21 = arith.andi %18, %20 : vector<10x10x1xi1>
    %c8_i32_8 = arith.constant 8 : i32
    %22 = vector.broadcast %c8_i32_8 : i32 to vector<10x10x1xi32>
    %23 = arith.cmpi sle, %13, %22 : vector<10x10x1xi32>
    %24 = arith.andi %21, %23 : vector<10x10x1xi1>
    %cst_9 = arith.constant 0.000000e+00 : f32
    %25 = vector.shape_cast %24 : vector<10x10x1xi1> to vector<10x10x1xi1>
    %26 = vector.broadcast %25 : vector<10x10x1xi1> to vector<10x10x128xi1>
    %27 = vector.broadcast %cst_9 : f32 to vector<10x10x128xf32>
    %28 = arith.select %26, %11, %27 : vector<10x10x128xi1>, vector<10x10x128xf32>
    %cst_10 = arith.constant 0.000000e+00 : f32
    %29 = vector.broadcast %cst_10 : f32 to vector<64x128xf32>
    %30 = vector.extract_strided_slice %28 {offsets = [0, 0, 0], sizes = [8, 8, 128], strides = [1, 1, 1]} : vector<10x10x128xf32> to vector<8x8x128xf32>
    %31 = vector.shape_cast %30 : vector<8x8x128xf32> to vector<64x128xf32>
    %c0_11 = arith.constant 0 : index
    %c0_12 = arith.constant 0 : index
    %c0_13 = arith.constant 0 : index
    %32 = vector.load %arg4[%c0_11, %c0_12, %c0_13] : memref<9x128x128xf32, #tpu.memory_space<vmem>>, vector<1x128x128xf32>
    %33 = vector.shape_cast %32 : vector<1x128x128xf32> to vector<128x128xf32>
    %cst_14 = arith.constant dense<0.000000e+00> : vector<64x128xf32>
    %34 = tpu.matmul %31, %33, %cst_14 {dimension_numbers = #tpu.dot_dimension_numbers<[1], [0], [0], [1], [0, 0, 1, 1], [], []>} : vector<64x128xf32>, vector<128x128xf32>, vector<64x128xf32> -> vector<64x128xf32>
    %35 = arith.addf %29, %34 : vector<64x128xf32>
    %36 = vector.extract_strided_slice %28 {offsets = [0, 1, 0], sizes = [8, 8, 128], strides = [1, 1, 1]} : vector<10x10x128xf32> to vector<8x8x128xf32>
    %37 = vector.shape_cast %36 : vector<8x8x128xf32> to vector<64x128xf32>
    %c1 = arith.constant 1 : index
    %c0_15 = arith.constant 0 : index
    %c0_16 = arith.constant 0 : index
    %38 = vector.load %arg4[%c1, %c0_15, %c0_16] : memref<9x128x128xf32, #tpu.memory_space<vmem>>, vector<1x128x128xf32>
    %39 = vector.shape_cast %38 : vector<1x128x128xf32> to vector<128x128xf32>
    %cst_17 = arith.constant dense<0.000000e+00> : vector<64x128xf32>
    %40 = tpu.matmul %37, %39, %cst_17 {dimension_numbers = #tpu.dot_dimension_numbers<[1], [0], [0], [1], [0, 0, 1, 1], [], []>} : vector<64x128xf32>, vector<128x128xf32>, vector<64x128xf32> -> vector<64x128xf32>
    %41 = arith.addf %35, %40 : vector<64x128xf32>
    %42 = vector.extract_strided_slice %28 {offsets = [0, 2, 0], sizes = [8, 8, 128], strides = [1, 1, 1]} : vector<10x10x128xf32> to vector<8x8x128xf32>
    %43 = vector.shape_cast %42 : vector<8x8x128xf32> to vector<64x128xf32>
    %c2 = arith.constant 2 : index
    %c0_18 = arith.constant 0 : index
    %c0_19 = arith.constant 0 : index
    %44 = vector.load %arg4[%c2, %c0_18, %c0_19] : memref<9x128x128xf32, #tpu.memory_space<vmem>>, vector<1x128x128xf32>
    %45 = vector.shape_cast %44 : vector<1x128x128xf32> to vector<128x128xf32>
    %cst_20 = arith.constant dense<0.000000e+00> : vector<64x128xf32>
    %46 = tpu.matmul %43, %45, %cst_20 {dimension_numbers = #tpu.dot_dimension_numbers<[1], [0], [0], [1], [0, 0, 1, 1], [], []>} : vector<64x128xf32>, vector<128x128xf32>, vector<64x128xf32> -> vector<64x128xf32>
    %47 = arith.addf %41, %46 : vector<64x128xf32>
    %48 = vector.extract_strided_slice %28 {offsets = [1, 0, 0], sizes = [8, 8, 128], strides = [1, 1, 1]} : vector<10x10x128xf32> to vector<8x8x128xf32>
    %49 = vector.shape_cast %48 : vector<8x8x128xf32> to vector<64x128xf32>
    %c3 = arith.constant 3 : index
    %c0_21 = arith.constant 0 : index
    %c0_22 = arith.constant 0 : index
    %50 = vector.load %arg4[%c3, %c0_21, %c0_22] : memref<9x128x128xf32, #tpu.memory_space<vmem>>, vector<1x128x128xf32>
    %51 = vector.shape_cast %50 : vector<1x128x128xf32> to vector<128x128xf32>
    %cst_23 = arith.constant dense<0.000000e+00> : vector<64x128xf32>
    %52 = tpu.matmul %49, %51, %cst_23 {dimension_numbers = #tpu.dot_dimension_numbers<[1], [0], [0], [1], [0, 0, 1, 1], [], []>} : vector<64x128xf32>, vector<128x128xf32>, vector<64x128xf32> -> vector<64x128xf32>
    %53 = arith.addf %47, %52 : vector<64x128xf32>
    %54 = vector.extract_strided_slice %28 {offsets = [1, 1, 0], sizes = [8, 8, 128], strides = [1, 1, 1]} : vector<10x10x128xf32> to vector<8x8x128xf32>
    %55 = vector.shape_cast %54 : vector<8x8x128xf32> to vector<64x128xf32>
    %c4 = arith.constant 4 : index
    %c0_24 = arith.constant 0 : index
    %c0_25 = arith.constant 0 : index
    %56 = vector.load %arg4[%c4, %c0_24, %c0_25] : memref<9x128x128xf32, #tpu.memory_space<vmem>>, vector<1x128x128xf32>
    %57 = vector.shape_cast %56 : vector<1x128x128xf32> to vector<128x128xf32>
    %cst_26 = arith.constant dense<0.000000e+00> : vector<64x128xf32>
    %58 = tpu.matmul %55, %57, %cst_26 {dimension_numbers = #tpu.dot_dimension_numbers<[1], [0], [0], [1], [0, 0, 1, 1], [], []>} : vector<64x128xf32>, vector<128x128xf32>, vector<64x128xf32> -> vector<64x128xf32>
    %59 = arith.addf %53, %58 : vector<64x128xf32>
    %60 = vector.extract_strided_slice %28 {offsets = [1, 2, 0], sizes = [8, 8, 128], strides = [1, 1, 1]} : vector<10x10x128xf32> to vector<8x8x128xf32>
    %61 = vector.shape_cast %60 : vector<8x8x128xf32> to vector<64x128xf32>
    %c5 = arith.constant 5 : index
    %c0_27 = arith.constant 0 : index
    %c0_28 = arith.constant 0 : index
    %62 = vector.load %arg4[%c5, %c0_27, %c0_28] : memref<9x128x128xf32, #tpu.memory_space<vmem>>, vector<1x128x128xf32>
    %63 = vector.shape_cast %62 : vector<1x128x128xf32> to vector<128x128xf32>
    %cst_29 = arith.constant dense<0.000000e+00> : vector<64x128xf32>
    %64 = tpu.matmul %61, %63, %cst_29 {dimension_numbers = #tpu.dot_dimension_numbers<[1], [0], [0], [1], [0, 0, 1, 1], [], []>} : vector<64x128xf32>, vector<128x128xf32>, vector<64x128xf32> -> vector<64x128xf32>
    %65 = arith.addf %59, %64 : vector<64x128xf32>
    %66 = vector.extract_strided_slice %28 {offsets = [2, 0, 0], sizes = [8, 8, 128], strides = [1, 1, 1]} : vector<10x10x128xf32> to vector<8x8x128xf32>
    %67 = vector.shape_cast %66 : vector<8x8x128xf32> to vector<64x128xf32>
    %c6 = arith.constant 6 : index
    %c0_30 = arith.constant 0 : index
    %c0_31 = arith.constant 0 : index
    %68 = vector.load %arg4[%c6, %c0_30, %c0_31] : memref<9x128x128xf32, #tpu.memory_space<vmem>>, vector<1x128x128xf32>
    %69 = vector.shape_cast %68 : vector<1x128x128xf32> to vector<128x128xf32>
    %cst_32 = arith.constant dense<0.000000e+00> : vector<64x128xf32>
    %70 = tpu.matmul %67, %69, %cst_32 {dimension_numbers = #tpu.dot_dimension_numbers<[1], [0], [0], [1], [0, 0, 1, 1], [], []>} : vector<64x128xf32>, vector<128x128xf32>, vector<64x128xf32> -> vector<64x128xf32>
    %71 = arith.addf %65, %70 : vector<64x128xf32>
    %72 = vector.extract_strided_slice %28 {offsets = [2, 1, 0], sizes = [8, 8, 128], strides = [1, 1, 1]} : vector<10x10x128xf32> to vector<8x8x128xf32>
    %73 = vector.shape_cast %72 : vector<8x8x128xf32> to vector<64x128xf32>
    %c7 = arith.constant 7 : index
    %c0_33 = arith.constant 0 : index
    %c0_34 = arith.constant 0 : index
    %74 = vector.load %arg4[%c7, %c0_33, %c0_34] : memref<9x128x128xf32, #tpu.memory_space<vmem>>, vector<1x128x128xf32>
    %75 = vector.shape_cast %74 : vector<1x128x128xf32> to vector<128x128xf32>
    %cst_35 = arith.constant dense<0.000000e+00> : vector<64x128xf32>
    %76 = tpu.matmul %73, %75, %cst_35 {dimension_numbers = #tpu.dot_dimension_numbers<[1], [0], [0], [1], [0, 0, 1, 1], [], []>} : vector<64x128xf32>, vector<128x128xf32>, vector<64x128xf32> -> vector<64x128xf32>
    %77 = arith.addf %71, %76 : vector<64x128xf32>
    %78 = vector.extract_strided_slice %28 {offsets = [2, 2, 0], sizes = [8, 8, 128], strides = [1, 1, 1]} : vector<10x10x128xf32> to vector<8x8x128xf32>
    %79 = vector.shape_cast %78 : vector<8x8x128xf32> to vector<64x128xf32>
    %c8 = arith.constant 8 : index
    %c0_36 = arith.constant 0 : index
    %c0_37 = arith.constant 0 : index
    %80 = vector.load %arg4[%c8, %c0_36, %c0_37] : memref<9x128x128xf32, #tpu.memory_space<vmem>>, vector<1x128x128xf32>
    %81 = vector.shape_cast %80 : vector<1x128x128xf32> to vector<128x128xf32>
    %cst_38 = arith.constant dense<0.000000e+00> : vector<64x128xf32>
    %82 = tpu.matmul %79, %81, %cst_38 {dimension_numbers = #tpu.dot_dimension_numbers<[1], [0], [0], [1], [0, 0, 1, 1], [], []>} : vector<64x128xf32>, vector<128x128xf32>, vector<64x128xf32> -> vector<64x128xf32>
    %83 = arith.addf %77, %82 : vector<64x128xf32>
    %c0_39 = arith.constant 0 : index
    %c0_40 = arith.constant 0 : index
    %c0_41 = arith.constant 0 : index
    %84 = vector.load %arg5[%c0_39, %c0_40, %c0_41] : memref<1x64x128xf32, #tpu.memory_space<vmem>>, vector<1x64x128xf32>
    %85 = vector.shape_cast %84 : vector<1x64x128xf32> to vector<64x128xf32>
    %86 = vector.shape_cast %83 : vector<64x128xf32> to vector<1x64x128xf32>
    tpu.vector_store %arg5[%c0_39, %c0_40, %c0_41], %86 {strides = array<i32>} : memref<1x64x128xf32, #tpu.memory_space<vmem>>, vector<1x64x128xf32>,
    %cst_42 = arith.constant dense<0.000000e+00> : vector<128xf32>
    %87 = vector.multi_reduction <add>, %83, %cst_42 [0] : vector<64x128xf32> to vector<128xf32>
    %88 = vector.shape_cast %87 : vector<128xf32> to vector<1x128xf32>
    %89 = arith.mulf %83, %83 : vector<64x128xf32>
    %cst_43 = arith.constant dense<0.000000e+00> : vector<128xf32>
    %90 = vector.multi_reduction <add>, %89, %cst_43 [0] : vector<64x128xf32> to vector<128xf32>
    %91 = vector.shape_cast %90 : vector<128xf32> to vector<1x128xf32>
    %92 = tpu.concatenate %88, %91 in 0 : vector<1x128xf32>, vector<1x128xf32> -> vector<2x128xf32>
    %93 = vector.shape_cast %92 : vector<2x128xf32> to vector<1x2x128xf32>
    %c0_44 = arith.constant 0 : index
    %c0_45 = arith.constant 0 : index
    %c0_46 = arith.constant 0 : index
    %94 = vector.load %arg6[%c0_44, %c0_45, %c0_46] : memref<1x2x128xf32, #tpu.memory_space<vmem>>, vector<1x2x128xf32>
    tpu.vector_store %arg6[%c0_44, %c0_45, %c0_46], %93 {strides = array<i32>} : memref<1x2x128xf32, #tpu.memory_space<vmem>>, vector<1x2x128xf32>,
    return
  }
  func.func @transform_0(%arg0: i32) -> (i32, i32, i32, i32) {
    %c0_i32 = arith.constant 0 : i32
    %c0_i32_0 = arith.constant 0 : i32
    %c0_i32_1 = arith.constant 0 : i32
    %c0_i32_2 = arith.constant 0 : i32
    return %arg0, %c0_i32, %c0_i32_0, %c0_i32_1 : i32, i32, i32, i32
  }
  func.func @transform_1(%arg0: i32) -> (i32, i32) {
    %c0_i32 = arith.constant 0 : i32
    %c0_i32_0 = arith.constant 0 : i32
    %c0_i32_1 = arith.constant 0 : i32
    return %c0_i32, %c0_i32_0 : i32, i32
  }
  func.func @transform_2(%arg0: i32) -> (i32, i32) {
    %c0_i32 = arith.constant 0 : i32
    %c0_i32_0 = arith.constant 0 : i32
    %c0_i32_1 = arith.constant 0 : i32
    return %c0_i32, %c0_i32_0 : i32, i32
  }
  func.func @transform_3(%arg0: i32) -> (i32, i32, i32) {
    %c0_i32 = arith.constant 0 : i32
    %c0_i32_0 = arith.constant 0 : i32
    %c0_i32_1 = arith.constant 0 : i32
    %c0_i32_2 = arith.constant 0 : i32
    return %c0_i32, %c0_i32_0, %c0_i32_1 : i32, i32, i32
  }
  func.func @transform_4(%arg0: i32) -> (i32, i32, i32) {
    %c0_i32 = arith.constant 0 : i32
    %c0_i32_0 = arith.constant 0 : i32
    %c0_i32_1 = arith.constant 0 : i32
    return %arg0, %c0_i32, %c0_i32_0 : i32, i32, i32
  }
  func.func @transform_5(%arg0: i32) -> (i32, i32, i32) {
    %c0_i32 = arith.constant 0 : i32
    %c0_i32_0 = arith.constant 0 : i32
    %c0_i32_1 = arith.constant 0 : i32
    return %arg0, %c0_i32, %c0_i32_0 : i32, i32, i32
  }
}

module attributes {stable_mosaic.version = 11 : i64} {
  func.func @_affine_res_relu_kernel(%arg0: i32, %arg1: memref<128x128xf32, #tpu.memory_space<vmem>>, %arg2: memref<1x128xf32, #tpu.memory_space<vmem>>, %arg3: memref<1x128xf32, #tpu.memory_space<vmem>>, %arg4: memref<128x128xf32, #tpu.memory_space<vmem>>, %arg5: memref<128x128xf32, #tpu.memory_space<vmem>>) attributes {dimension_semantics = [#tpu.dimension_semantics<parallel>], iteration_bounds = array<i64: 1>, scalar_prefetch = 0 : i64, scratch_operands = 0 : i64, tpu.core_type = #tpu.core_type<tc>, window_params = [{transform_indices = @transform_0, window_bounds = array<i64: 128, 128>}, {pipeline_mode = #tpu.pipeline_mode<synchronous>, transform_indices = @transform_1, window_bounds = array<i64: 1, 128>}, {pipeline_mode = #tpu.pipeline_mode<synchronous>, transform_indices = @transform_2, window_bounds = array<i64: 1, 128>}, {transform_indices = @transform_3, window_bounds = array<i64: 128, 128>}, {transform_indices = @transform_4, window_bounds = array<i64: 128, 128>}]} {
    %c0 = arith.constant 0 : index
    %c0_0 = arith.constant 0 : index
    %0 = vector.load %arg1[%c0, %c0_0] : memref<128x128xf32, #tpu.memory_space<vmem>>, vector<128x128xf32>
    %c0_1 = arith.constant 0 : index
    %c0_2 = arith.constant 0 : index
    %1 = vector.load %arg2[%c0_1, %c0_2] : memref<1x128xf32, #tpu.memory_space<vmem>>, vector<1x128xf32>
    %2 = vector.broadcast %1 : vector<1x128xf32> to vector<128x128xf32>
    %3 = arith.mulf %0, %2 : vector<128x128xf32>
    %c0_3 = arith.constant 0 : index
    %c0_4 = arith.constant 0 : index
    %4 = vector.load %arg3[%c0_3, %c0_4] : memref<1x128xf32, #tpu.memory_space<vmem>>, vector<1x128xf32>
    %5 = vector.broadcast %4 : vector<1x128xf32> to vector<128x128xf32>
    %6 = arith.addf %3, %5 : vector<128x128xf32>
    %c0_5 = arith.constant 0 : index
    %c0_6 = arith.constant 0 : index
    %7 = vector.load %arg4[%c0_5, %c0_6] : memref<128x128xf32, #tpu.memory_space<vmem>>, vector<128x128xf32>
    %8 = arith.addf %6, %7 : vector<128x128xf32>
    %cst = arith.constant 0.000000e+00 : f32
    %9 = vector.broadcast %cst : f32 to vector<128x128xf32>
    %10 = arith.maximumf %8, %9 : vector<128x128xf32>
    %c0_7 = arith.constant 0 : index
    %c0_8 = arith.constant 0 : index
    %11 = vector.load %arg5[%c0_7, %c0_8] : memref<128x128xf32, #tpu.memory_space<vmem>>, vector<128x128xf32>
    tpu.vector_store %arg5[%c0_7, %c0_8], %10 {strides = array<i32>} : memref<128x128xf32, #tpu.memory_space<vmem>>, vector<128x128xf32>,
    return
  }
  func.func @transform_0(%arg0: i32) -> (i32, i32) {
    %c0_i32 = arith.constant 0 : i32
    %c0_i32_0 = arith.constant 0 : i32
    return %arg0, %c0_i32 : i32, i32
  }
  func.func @transform_1(%arg0: i32) -> (i32, i32) {
    %c0_i32 = arith.constant 0 : i32
    %c0_i32_0 = arith.constant 0 : i32
    %c0_i32_1 = arith.constant 0 : i32
    return %c0_i32, %c0_i32_0 : i32, i32
  }
  func.func @transform_2(%arg0: i32) -> (i32, i32) {
    %c0_i32 = arith.constant 0 : i32
    %c0_i32_0 = arith.constant 0 : i32
    %c0_i32_1 = arith.constant 0 : i32
    return %c0_i32, %c0_i32_0 : i32, i32
  }
  func.func @transform_3(%arg0: i32) -> (i32, i32) {
    %c0_i32 = arith.constant 0 : i32
    %c0_i32_0 = arith.constant 0 : i32
    return %arg0, %c0_i32 : i32, i32
  }
  func.func @transform_4(%arg0: i32) -> (i32, i32) {
    %c0_i32 = arith.constant 0 : i32
    %c0_i32_0 = arith.constant 0 : i32
    return %arg0, %c0_i32 : i32, i32
  }
}

module attributes {stable_mosaic.version = 11 : i64} {
  func.func @_affine_gemm_stats_kernel(%arg0: i32, %arg1: memref<128x128xf32, #tpu.memory_space<vmem>>, %arg2: memref<1x128xf32, #tpu.memory_space<vmem>>, %arg3: memref<1x128xf32, #tpu.memory_space<vmem>>, %arg4: memref<128x128xf32, #tpu.memory_space<vmem>>, %arg5: memref<128x128xf32, #tpu.memory_space<vmem>>, %arg6: memref<1x2x128xf32, #tpu.memory_space<vmem>>) attributes {dimension_semantics = [#tpu.dimension_semantics<parallel>], iteration_bounds = array<i64: 1>, scalar_prefetch = 0 : i64, scratch_operands = 0 : i64, tpu.core_type = #tpu.core_type<tc>, window_params = [{transform_indices = @transform_0, window_bounds = array<i64: 128, 128>}, {pipeline_mode = #tpu.pipeline_mode<synchronous>, transform_indices = @transform_1, window_bounds = array<i64: 1, 128>}, {pipeline_mode = #tpu.pipeline_mode<synchronous>, transform_indices = @transform_2, window_bounds = array<i64: 1, 128>}, {pipeline_mode = #tpu.pipeline_mode<synchronous>, transform_indices = @transform_3, window_bounds = array<i64: 128, 128>}, {transform_indices = @transform_4, window_bounds = array<i64: 128, 128>}, {transform_indices = @transform_5, window_bounds = array<i64: 1, 2, 128>}]} {
    %c0 = arith.constant 0 : index
    %c0_0 = arith.constant 0 : index
    %0 = vector.load %arg1[%c0, %c0_0] : memref<128x128xf32, #tpu.memory_space<vmem>>, vector<128x128xf32>
    %c0_1 = arith.constant 0 : index
    %c0_2 = arith.constant 0 : index
    %1 = vector.load %arg2[%c0_1, %c0_2] : memref<1x128xf32, #tpu.memory_space<vmem>>, vector<1x128xf32>
    %2 = vector.broadcast %1 : vector<1x128xf32> to vector<128x128xf32>
    %3 = arith.mulf %0, %2 : vector<128x128xf32>
    %c0_3 = arith.constant 0 : index
    %c0_4 = arith.constant 0 : index
    %4 = vector.load %arg3[%c0_3, %c0_4] : memref<1x128xf32, #tpu.memory_space<vmem>>, vector<1x128xf32>
    %5 = vector.broadcast %4 : vector<1x128xf32> to vector<128x128xf32>
    %6 = arith.addf %3, %5 : vector<128x128xf32>
    %cst = arith.constant 0.000000e+00 : f32
    %7 = vector.broadcast %cst : f32 to vector<128x128xf32>
    %8 = arith.maximumf %6, %7 : vector<128x128xf32>
    %c0_5 = arith.constant 0 : index
    %c0_6 = arith.constant 0 : index
    %9 = vector.load %arg4[%c0_5, %c0_6] : memref<128x128xf32, #tpu.memory_space<vmem>>, vector<128x128xf32>
    %cst_7 = arith.constant dense<0.000000e+00> : vector<128x128xf32>
    %10 = tpu.matmul %8, %9, %cst_7 {dimension_numbers = #tpu.dot_dimension_numbers<[1], [0], [0], [1], [0, 0, 1, 1], [], []>} : vector<128x128xf32>, vector<128x128xf32>, vector<128x128xf32> -> vector<128x128xf32>
    %c0_8 = arith.constant 0 : index
    %c0_9 = arith.constant 0 : index
    %11 = vector.load %arg5[%c0_8, %c0_9] : memref<128x128xf32, #tpu.memory_space<vmem>>, vector<128x128xf32>
    tpu.vector_store %arg5[%c0_8, %c0_9], %10 {strides = array<i32>} : memref<128x128xf32, #tpu.memory_space<vmem>>, vector<128x128xf32>,
    %cst_10 = arith.constant dense<0.000000e+00> : vector<128xf32>
    %12 = vector.multi_reduction <add>, %10, %cst_10 [0] : vector<128x128xf32> to vector<128xf32>
    %13 = vector.shape_cast %12 : vector<128xf32> to vector<1x128xf32>
    %14 = arith.mulf %10, %10 : vector<128x128xf32>
    %cst_11 = arith.constant dense<0.000000e+00> : vector<128xf32>
    %15 = vector.multi_reduction <add>, %14, %cst_11 [0] : vector<128x128xf32> to vector<128xf32>
    %16 = vector.shape_cast %15 : vector<128xf32> to vector<1x128xf32>
    %17 = tpu.concatenate %13, %16 in 0 : vector<1x128xf32>, vector<1x128xf32> -> vector<2x128xf32>
    %18 = vector.shape_cast %17 : vector<2x128xf32> to vector<1x2x128xf32>
    %c0_12 = arith.constant 0 : index
    %c0_13 = arith.constant 0 : index
    %c0_14 = arith.constant 0 : index
    %19 = vector.load %arg6[%c0_12, %c0_13, %c0_14] : memref<1x2x128xf32, #tpu.memory_space<vmem>>, vector<1x2x128xf32>
    tpu.vector_store %arg6[%c0_12, %c0_13, %c0_14], %18 {strides = array<i32>} : memref<1x2x128xf32, #tpu.memory_space<vmem>>, vector<1x2x128xf32>,
    return
  }
  func.func @transform_0(%arg0: i32) -> (i32, i32) {
    %c0_i32 = arith.constant 0 : i32
    %c0_i32_0 = arith.constant 0 : i32
    return %arg0, %c0_i32 : i32, i32
  }
  func.func @transform_1(%arg0: i32) -> (i32, i32) {
    %c0_i32 = arith.constant 0 : i32
    %c0_i32_0 = arith.constant 0 : i32
    %c0_i32_1 = arith.constant 0 : i32
    return %c0_i32, %c0_i32_0 : i32, i32
  }
  func.func @transform_2(%arg0: i32) -> (i32, i32) {
    %c0_i32 = arith.constant 0 : i32
    %c0_i32_0 = arith.constant 0 : i32
    %c0_i32_1 = arith.constant 0 : i32
    return %c0_i32, %c0_i32_0 : i32, i32
  }
  func.func @transform_3(%arg0: i32) -> (i32, i32) {
    %c0_i32 = arith.constant 0 : i32
    %c0_i32_0 = arith.constant 0 : i32
    %c0_i32_1 = arith.constant 0 : i32
    return %c0_i32, %c0_i32_0 : i32, i32
  }
  func.func @transform_4(%arg0: i32) -> (i32, i32) {
    %c0_i32 = arith.constant 0 : i32
    %c0_i32_0 = arith.constant 0 : i32
    return %arg0, %c0_i32 : i32, i32
  }
  func.func @transform_5(%arg0: i32) -> (i32, i32, i32) {
    %c0_i32 = arith.constant 0 : i32
    %c0_i32_0 = arith.constant 0 : i32
    %c0_i32_1 = arith.constant 0 : i32
    return %arg0, %c0_i32, %c0_i32_0 : i32, i32, i32
  }
}

</mosaic_0001>

<bundles_post_ra>
// kernel: resblock_forward.4
= control target key start
LH: loop header
LB: loop body
LE: loop exit
PB: predicated region body
PF: predicated region fallthrough
CT: control target
= control target key end

     0   :  { %vm264_vm0 = vcmask 1040384   ;;  %s578_s1 = inlined_call_operand.vmem [shape: f32[128,128], index: 1, kind: input, shape index: {}]   ;;  %s579_s0 = inlined_call_operand.vmem [shape: f32[128,128], index: 0, kind: input, shape index: {}]   ;;  %s580_s2 = inlined_call_operand.vmem [shape: f32[128,128], index: 2, kind: output, shape index: {0}]   ;;  %s581_s3 = inlined_call_operand.vmem [shape: f32[1,2,128], index: 3, kind: output, shape index: {1}]  }
   0x1   :  { %v29_v0 = vld [vmem:[%s578_s1] sm:$0xff]  ;;  %v30_v1 = vld [vmem:[%s578_s1 + $0x8] sm:$0xff]  ;;  %v31_v2 = vld [vmem:[%s578_s1 + $0x10] sm:$0xff] }
   0x2   :  { %v363_v3 = vpack.c.bf16 %v30_v1, %v29_v0  ;;  %v32_v4 = vld [vmem:[%s578_s1 + $0x18] sm:$0xff]  ;;  %v33_v6 = vld [vmem:[%s578_s1 + $0x20] sm:$0xff]  ;;  %v34_v7 = vld [vmem:[%s578_s1 + $0x28] sm:$0xff] }
   0x3   :  { %v367_v5 = vpack.c.bf16 %v32_v4, %v31_v2  ;;  %v371_v8 = vpack.c.bf16 %v34_v7, %v33_v6  ;;  %v13_v9 = vld [vmem:[%s579_s0] sm:$0xff]  ;;  %v35_v10 = vld [vmem:[%s578_s1 + $0x30] sm:$0xff]  ;;  %v36_v11 = vld [vmem:[%s578_s1 + $0x38] sm:$0xff] }
   0x4   :  { %364 = vmatprep.subr.bf16.mxu0 %v363_v3  ;;  %395 = vmatprep.subr.bf16.mxu1 %v363_v3  ;;  %v21_v12 = vld [vmem:[%s579_s0 + $0x40] sm:$0xff]  ;;  %v375_v13 = vpack.c.bf16 %v36_v11, %v35_v10  ;;  %v38_v15 = vld [vmem:[%s578_s1 + $0x48] sm:$0xff]  ;;  %v39_v17 = vld [vmem:[%s578_s1 + $0x50] sm:$0xff] }
   0x5   :  { %366 = vmatpush3.bf16.msra.mxu0 %v363_v3  ;;  %403 = vmatpush3.bf16.msra.mxu1 %v363_v3  ;;  %v37_v14 = vld [vmem:[%s578_s1 + $0x40] sm:$0xff]  ;;  %v40_v18 = vld [vmem:[%s578_s1 + $0x58] sm:$0xff]  ;;  %v42_v21 = vld [vmem:[%s578_s1 + $0x68] sm:$0xff] }
   0x6   :  { %368 = vmatprep.subr.bf16.mxu0 %v367_v5  ;;  %396 = vmatprep.subr.bf16.mxu1 %v367_v5  ;;  %v379_v16 = vpack.c.bf16 %v38_v15, %v37_v14  ;;  %v383_v19 = vpack.c.bf16 %v40_v18, %v39_v17  ;;  %v41_v20 = vld [vmem:[%s578_s1 + $0x60] sm:$0xff]  ;;  %v43_v23 = vld [vmem:[%s578_s1 + $0x70] sm:$0xff]  ;;  %v44_v24 = vld [vmem:[%s578_s1 + $0x78] sm:$0xff] }
   0x7   :  { %339 = vmatprep.mubr.f32.mxu0 %v13_v9  ;;  %351 = vmatprep.mubr.f32.mxu1 %v21_v12  ;;  %v387_v22 = vpack.c.bf16 %v42_v21, %v41_v20  ;;  %v391_v25 = vpack.c.bf16 %v44_v24, %v43_v23  ;;  %v14_v26 = vld [vmem:[%s579_s0 + $0x8] sm:$0xff]  ;;  %v15_v28 = vld [vmem:[%s579_s0 + $0x10] sm:$0xff]  ;;  %v16_v30 = vld [vmem:[%s579_s0 + $0x18] sm:$0xff] }
   0x8   :  { %v22_v27 = vld [vmem:[%s579_s0 + $0x48] sm:$0xff]  ;;  %v23_v29 = vld [vmem:[%s579_s0 + $0x50] sm:$0xff]  ;;  %v24_v31 = vld [vmem:[%s579_s0 + $0x58] sm:$0xff] }
   0x9   :  { %370 = vmatpush3.bf16.msra.mxu0 %v367_v5  ;;  %404 = vmatpush3.bf16.msra.mxu1 %v367_v5  ;;  %v17_v32 = vld [vmem:[%s579_s0 + $0x20] sm:$0xff]  ;;  %v18_v34 = vld [vmem:[%s579_s0 + $0x28] sm:$0xff]  ;;  %v19_v36 = vld [vmem:[%s579_s0 + $0x30] sm:$0xff] }
   0xa   :  { %372 = vmatprep.subr.bf16.mxu0 %v371_v8  ;;  %397 = vmatprep.subr.bf16.mxu1 %v371_v8  ;;  %v25_v33 = vld [vmem:[%s579_s0 + $0x60] sm:$0xff]  ;;  %v26_v35 = vld [vmem:[%s579_s0 + $0x68] sm:$0xff]  ;;  %v27_v37 = vld [vmem:[%s579_s0 + $0x70] sm:$0xff] }
   0xb   :  { %v20_v38 = vld [vmem:[%s579_s0 + $0x38] sm:$0xff] }
   0xc   :  { %v28_v39 = vld [vmem:[%s579_s0 + $0x78] sm:$0xff] }
   0xd   :  { %374 = vmatpush3.bf16.msra.mxu0 %v371_v8  ;;  %405 = vmatpush3.bf16.msra.mxu1 %v371_v8 }
   0xe   :  { %376 = vmatprep.subr.bf16.mxu0 %v375_v13  ;;  %398 = vmatprep.subr.bf16.mxu1 %v375_v13 }
  0x11   :  { %378 = vmatpush3.bf16.msra.mxu0 %v375_v13  ;;  %406 = vmatpush3.bf16.msra.mxu1 %v375_v13 }
  0x12   :  { %380 = vmatprep.subr.bf16.mxu0 %v379_v16  ;;  %399 = vmatprep.subr.bf16.mxu1 %v379_v16 }
  0x15   :  { %382 = vmatpush3.bf16.msra.mxu0 %v379_v16  ;;  %407 = vmatpush3.bf16.msra.mxu1 %v379_v16 }
  0x16   :  { %384 = vmatprep.subr.bf16.mxu0 %v383_v19  ;;  %400 = vmatprep.subr.bf16.mxu1 %v383_v19 }
  0x19   :  { %386 = vmatpush3.bf16.msra.mxu0 %v383_v19  ;;  %408 = vmatpush3.bf16.msra.mxu1 %v383_v19 }
  0x1a   :  { %388 = vmatprep.subr.bf16.mxu0 %v387_v22  ;;  %401 = vmatprep.subr.bf16.mxu1 %v387_v22 }
  0x1d   :  { %390 = vmatpush3.bf16.msra.mxu0 %v387_v22  ;;  %409 = vmatpush3.bf16.msra.mxu1 %v387_v22 }
  0x1e   :  { %392 = vmatprep.subr.bf16.mxu0 %v391_v25  ;;  %402 = vmatprep.subr.bf16.mxu1 %v391_v25 }
  0x21   :  { %394 = vmatpush3.bf16.msra.mxu0 %v391_v25  ;;  %410 = vmatpush3.bf16.msra.mxu1 %v391_v25 }
  0x24   :  { %340 = vmatmul.mubr.f32.vlgmr.msra.gmra.mrb[0].mxu0 %v14_v26  ;;  %352 = vmatmul.mubr.f32.vlgmr.msra.gmra.mrb[0].mxu1 %v22_v27 }
  0x25   :  { %342 = vmatprep.mubr.f32.mxu0 %v15_v28  ;;  %354 = vmatprep.mubr.f32.mxu1 %v23_v29 }
  0x28   :  { %343 = vmatmul.mubr.f32.gmra.mrb[2].mxu0 %v16_v30  ;;  %355 = vmatmul.mubr.f32.gmra.mrb[2].mxu1 %v24_v31 }
  0x29   :  { %345 = vmatprep.mubr.f32.mxu0 %v17_v32  ;;  %357 = vmatprep.mubr.f32.mxu1 %v25_v33 }
  0x2c   :  { %346 = vmatmul.mubr.f32.gmra.mrb[4].mxu0 %v18_v34  ;;  %358 = vmatmul.mubr.f32.gmra.mrb[4].mxu1 %v26_v35 }
  0x2d   :  { %348 = vmatprep.mubr.f32.mxu0 %v19_v36  ;;  %360 = vmatprep.mubr.f32.mxu1 %v27_v37 }
  0x30   :  { %349 = vmatmul.mubr.f32.gmra.mrb[6].mxu0 %v20_v38  ;;  %361 = vmatmul.mubr.f32.gmra.mrb[6].mxu1 %v28_v39 }
  0xf7   :  { %v341_v40 = vpop.f32.mrb[0].mxu0  ;;  %v353_v41 = vpop.f32.mrb[0].mxu1 }
  0xf8   :  { %191 = vst [vmem:[%s580_s2 + $0x8] sm:$0xff] %v341_v40  ;;  %v228_v42 = vmul.f32 %v341_v40, %v341_v40  ;;  %v111_v43 = vpop.f32.mrb[1].mxu0  ;;  %199 = vst [vmem:[%s580_s2 + $0x48] sm:$0xff] %v353_v41  ;;  %v151_v44 = vpop.f32.mrb[1].mxu1  ;;  %v236_v16 = vmul.f32 %v353_v41, %v353_v41 }
  0xf9   :  { %190 = vst [vmem:[%s580_s2] sm:$0xff] %v111_v43  ;;  %v206_v45 = vadd.f32 %v341_v40, %v111_v43  ;;  %v227_v46 = vmul.f32 %v111_v43, %v111_v43  ;;  %198 = vst [vmem:[%s580_s2 + $0x40] sm:$0xff] %v151_v44  ;;  %v235_v13 = vmul.f32 %v151_v44, %v151_v44 }
  0xfb   :  { %v243_v47 = vadd.f32 %v228_v42, %v227_v46  ;;  %v344_v48 = vpop.f32.mrb[2].mxu0  ;;  %v356_v49 = vpop.f32.mrb[2].mxu1 }
  0xfc   :  { %193 = vst [vmem:[%s580_s2 + $0x18] sm:$0xff] %v344_v48  ;;  %v121_v50 = vpop.f32.mrb[3].mxu0  ;;  %201 = vst [vmem:[%s580_s2 + $0x58] sm:$0xff] %v356_v49  ;;  %v161_v51 = vpop.f32.mrb[3].mxu1  ;;  %v230_v54 = vmul.f32 %v344_v48, %v344_v48  ;;  %v238_v22 = vmul.f32 %v356_v49, %v356_v49 }
  0xfd   :  { %192 = vst [vmem:[%s580_s2 + $0x10] sm:$0xff] %v121_v50  ;;  %v207_v52 = vadd.f32 %v206_v45, %v121_v50  ;;  %v229_v53 = vmul.f32 %v121_v50, %v121_v50  ;;  %200 = vst [vmem:[%s580_s2 + $0x50] sm:$0xff] %v161_v51  ;;  %v237_v19 = vmul.f32 %v161_v51, %v161_v51 }
  0xff   :  { %v244_v55 = vadd.f32 %v243_v47, %v229_v53  ;;  %v347_v56 = vpop.f32.mrb[4].mxu0  ;;  %v208_v57 = vadd.f32 %v344_v48, %v207_v52  ;;  %v359_v58 = vpop.f32.mrb[4].mxu1 }
 0x100   :  { %195 = vst [vmem:[%s580_s2 + $0x28] sm:$0xff] %v347_v56  ;;  %v131_v59 = vpop.f32.mrb[5].mxu0  ;;  %203 = vst [vmem:[%s580_s2 + $0x68] sm:$0xff] %v359_v58  ;;  %v171_v60 = vpop.f32.mrb[5].mxu1  ;;  %v232_v0 = vmul.f32 %v347_v56, %v347_v56  ;;  %v240_v28 = vmul.f32 %v359_v58, %v359_v58 }
 0x101   :  { %194 = vst [vmem:[%s580_s2 + $0x20] sm:$0xff] %v131_v59  ;;  %v209_v61 = vadd.f32 %v208_v57, %v131_v59  ;;  %v231_v62 = vmul.f32 %v131_v59, %v131_v59  ;;  %v245_v63 = vadd.f32 %v244_v55, %v230_v54  ;;  %202 = vst [vmem:[%s580_s2 + $0x60] sm:$0xff] %v171_v60 }
 0x102   :  { %v239_v25 = vmul.f32 %v171_v60, %v171_v60 }
 0x103   :  { %v246_v1 = vadd.f32 %v245_v63, %v231_v62  ;;  %v350_v2 = vpop.f32.mrb[6].mxu0  ;;  %v210_v3 = vadd.f32 %v347_v56, %v209_v61  ;;  %v362_v4 = vpop.f32.mrb[6].mxu1 }
 0x104   :  { %197 = vst [vmem:[%s580_s2 + $0x38] sm:$0xff] %v350_v2  ;;  %v141_v5 = vpop.f32.mrb[7].mxu0  ;;  %205 = vst [vmem:[%s580_s2 + $0x78] sm:$0xff] %v362_v4  ;;  %v181_v6 = vpop.f32.mrb[7].mxu1  ;;  %v234_v10 = vmul.f32 %v350_v2, %v350_v2  ;;  %v242_v34 = vmul.f32 %v362_v4, %v362_v4 }
 0x105   :  { %196 = vst [vmem:[%s580_s2 + $0x30] sm:$0xff] %v141_v5  ;;  %v211_v7 = vadd.f32 %v210_v3, %v141_v5  ;;  %v233_v8 = vmul.f32 %v141_v5, %v141_v5  ;;  %v247_v9 = vadd.f32 %v246_v1, %v232_v0  ;;  %204 = vst [vmem:[%s580_s2 + $0x70] sm:$0xff] %v181_v6 }
 0x106   :  { %v241_v31 = vmul.f32 %v181_v6, %v181_v6 }
 0x107   :  { %v212_v11 = vadd.f32 %v350_v2, %v211_v7  ;;  %v248_v12 = vadd.f32 %v247_v9, %v233_v8 }
 0x109   :  { %v249_v14 = vadd.f32 %v248_v12, %v234_v10  ;;  %v213_v15 = vadd.f32 %v212_v11, %v151_v44 }
 0x10b   :  { %v250_v17 = vadd.f32 %v249_v14, %v235_v13  ;;  %v214_v18 = vadd.f32 %v353_v41, %v213_v15 }
 0x10d   :  { %v215_v20 = vadd.f32 %v214_v18, %v161_v51  ;;  %v251_v21 = vadd.f32 %v250_v17, %v236_v16 }
 0x10f   :  { %v252_v23 = vadd.f32 %v251_v21, %v237_v19  ;;  %v216_v24 = vadd.f32 %v356_v49, %v215_v20 }
 0x111   :  { %v217_v26 = vadd.f32 %v216_v24, %v171_v60  ;;  %v253_v27 = vadd.f32 %v252_v23, %v238_v22 }
 0x113   :  { %v254_v29 = vadd.f32 %v253_v27, %v239_v25  ;;  %v218_v30 = vadd.f32 %v359_v58, %v217_v26 }
 0x115   :  { %v219_v32 = vadd.f32 %v218_v30, %v181_v6  ;;  %v255_v33 = vadd.f32 %v254_v29, %v240_v28 }
 0x117   :  { %v220_v35 = vadd.f32 %v362_v4, %v219_v32  ;;  %v256_v36 = vadd.f32 %v255_v33, %v241_v31 }
 0x119   :  { %v221_v37 = vrot.slane %v220_v35, 4  ;;  %v257_v38 = vadd.f32 %v256_v36, %v242_v34 }
 0x11b   :  { %v222_v39 = vadd.f32 %v221_v37, %v220_v35  ;;  %v258_v40 = vrot.slane %v257_v38, 4 }
 0x11d   :  { %v223_v41 = vrot.slane %v222_v39, 2  ;;  %v259_v42 = vadd.f32 %v258_v40, %v257_v38 }
 0x11f   :  { %v224_v43 = vadd.f32 %v223_v41, %v222_v39  ;;  %v260_v44 = vrot.slane %v259_v42, 2 }
 0x121   :  { %v225_v45 = vrot.slane %v224_v43, 1  ;;  %v261_v46 = vadd.f32 %v260_v44, %v259_v42 }
 0x123   :  { %v262_v47 = vrot.slane %v261_v46, 1  ;;  %v226_v48 = vadd.f32 %v225_v45, %v224_v43 }
 0x125   :  { %v263_v49 = vadd.f32 %v262_v47, %v261_v46 }
 0x127   :  { %v265_v50 = vsel %vm264_vm0, %v226_v48, %v263_v49 }
 0x128   :  { %266 = vst [vmem:[%s581_s3] sm:$0x3] %v265_v50 }

// kernel: resblock_forward.7
= control target key start
LH: loop header
LB: loop body
LE: loop exit
PB: predicated region body
PF: predicated region fallthrough
CT: control target
= control target key end

     0   :  { %s367_s0 = inlined_call_operand.vmem [shape: f32[128,128], index: 0, kind: input, shape index: {}]   ;;  %s368_s1 = inlined_call_operand.vmem [shape: f32[1,128], index: 1, kind: input, shape index: {}]   ;;  %s369_s2 = inlined_call_operand.vmem [shape: f32[1,128], index: 2, kind: input, shape index: {}]   ;;  %s370_s3 = inlined_call_operand.vmem [shape: f32[128,128], index: 3, kind: input, shape index: {}]   ;;  %s371_s4 = inlined_call_operand.hbm [shape: f32[128,128], index: 4, kind: output, shape index: {}]  }
   0x1   :  { %v18_v0 = vld [vmem:[%s367_s0] sm:$0xff]  ;;  %v19_v4 = vld [vmem:[%s367_s0 + $0x8] sm:$0xff]  ;;  %v20_v7 = vld [vmem:[%s367_s0 + $0x10] sm:$0xff] }
   0x2   :  { %v223_v1 = vld [vmem:[%s368_s1] ss:$0 sm:$0xff]  ;;  %v21_v8 = vld [vmem:[%s367_s0 + $0x18] sm:$0xff]  ;;  %v81_v10 = vld [vmem:[%s370_s3 + $0x8] sm:$0xff] }
   0x3   :  { %v228_v2 = vld [vmem:[%s369_s2] ss:$0 sm:$0xff]  ;;  %v41_v3 = vmul.f32 %v223_v1, %v18_v0  ;;  %v42_v6 = vmul.f32 %v223_v1, %v19_v4  ;;  %v43_v11 = vmul.f32 %v223_v1, %v20_v7  ;;  %v82_v12 = vld [vmem:[%s370_s3 + $0x10] sm:$0xff]  ;;  %v44_v13 = vmul.f32 %v223_v1, %v21_v8  ;;  %v83_v16 = vld [vmem:[%s370_s3 + $0x18] sm:$0xff] }
   0x4   :  { %v80_v5 = vld [vmem:[%s370_s3] sm:$0xff]  ;;  %v23_v18 = vld [vmem:[%s367_s0 + $0x28] sm:$0xff]  ;;  %v24_v19 = vld [vmem:[%s367_s0 + $0x30] sm:$0xff] }
   0x5   :  { %v64_v9 = vadd.f32 %v228_v2, %v41_v3  ;;  %v22_v14 = vld [vmem:[%s367_s0 + $0x20] sm:$0xff]  ;;  %v65_v15 = vadd.f32 %v228_v2, %v42_v6  ;;  %v66_v21 = vadd.f32 %v228_v2, %v43_v11  ;;  %v67_v22 = vadd.f32 %v228_v2, %v44_v13  ;;  %v25_v25 = vld [vmem:[%s367_s0 + $0x38] sm:$0xff]  ;;  %v85_v28 = vld [vmem:[%s370_s3 + $0x28] sm:$0xff] }
   0x6   :  { %v45_v17 = vmul.f32 %v223_v1, %v22_v14  ;;  %v84_v23 = vld [vmem:[%s370_s3 + $0x20] sm:$0xff]  ;;  %v46_v24 = vmul.f32 %v223_v1, %v23_v18  ;;  %v47_v29 = vmul.f32 %v223_v1, %v24_v19  ;;  %v48_v30 = vmul.f32 %v223_v1, %v25_v25  ;;  %v86_v36 = vld [vmem:[%s370_s3 + $0x30] sm:$0xff]  ;;  %v87_v37 = vld [vmem:[%s370_s3 + $0x38] sm:$0xff] }
   0x7   :  { %v96_v20 = vadd.f32 %v80_v5, %v64_v9  ;;  %v97_v26 = vadd.f32 %v81_v10, %v65_v15  ;;  %v26_v31 = vld [vmem:[%s367_s0 + $0x40] sm:$0xff]  ;;  %v98_v33 = vadd.f32 %v82_v12, %v66_v21  ;;  %v99_v34 = vadd.f32 %v83_v16, %v67_v22  ;;  %v27_v38 = vld [vmem:[%s367_s0 + $0x48] sm:$0xff]  ;;  %v28_v43 = vld [vmem:[%s367_s0 + $0x50] sm:$0xff] }
   0x8   :  { %v68_v27 = vadd.f32 %v228_v2, %v45_v17  ;;  %v69_v35 = vadd.f32 %v228_v2, %v46_v24  ;;  %v70_v41 = vadd.f32 %v228_v2, %v47_v29  ;;  %v71_v42 = vadd.f32 %v228_v2, %v48_v30  ;;  %v29_v44 = vld [vmem:[%s367_s0 + $0x58] sm:$0xff]  ;;  %v30_v49 = vld [vmem:[%s367_s0 + $0x60] sm:$0xff]  ;;  %v89_v55 = vld [vmem:[%s370_s3 + $0x48] sm:$0xff] }
   0x9   :  { %v112_v32 = vmax.f32 %v96_v20, 0.0  ;;  %v113_v39 = vmax.f32 %v97_v26, 0.0  ;;  %v114_v45 = vmax.f32 %v98_v33, 0.0  ;;  %v115_v46 = vmax.f32 %v99_v34, 0.0  ;;  %v88_v53 = vld [vmem:[%s370_s3 + $0x40] sm:$0xff]  ;;  %v31_v56 = vld [vmem:[%s367_s0 + $0x68] sm:$0xff] }
   0xa   :  { %v100_v40 = vadd.f32 %v84_v23, %v68_v27  ;;  %v101_v47 = vadd.f32 %v85_v28, %v69_v35  ;;  %v49_v48 = vmul.f32 %v223_v1, %v26_v31  ;;  %v102_v51 = vadd.f32 %v86_v36, %v70_v41  ;;  %v32_v61 = vld [vmem:[%s367_s0 + $0x70] sm:$0xff]  ;;  %v33_v62 = vld [vmem:[%s367_s0 + $0x78] sm:$0xff] }
   0xb   :  { %128 = vst [vmem:[#allocation2] sm:$0xff] %v112_v32  ;;  %129 = vst [vmem:[#allocation2 + $0x8] sm:$0xff] %v113_v39  ;;  %v103_v52 = vadd.f32 %v87_v37, %v71_v42  ;;  %v50_v54 = vmul.f32 %v223_v1, %v27_v38  ;;  %v51_v59 = vmul.f32 %v223_v1, %v28_v43 }
   0xc   :  { %v116_v50 = vmax.f32 %v100_v40, 0.0  ;;  %130 = vst [vmem:[#allocation2 + $0x10] sm:$0xff] %v114_v45  ;;  %131 = vst [vmem:[#allocation2 + $0x18] sm:$0xff] %v115_v46  ;;  %v117_v57 = vmax.f32 %v101_v47, 0.0  ;;  %v72_v58 = vadd.f32 %v228_v2, %v49_v48  ;;  %v52_v60 = vmul.f32 %v223_v1, %v29_v44 }
   0xd   :  { %9 = vsyncpa [#allocation3], 0  ;;  %v118_v63 = vmax.f32 %v102_v51, 0.0  ;;  %v119_v0 = vmax.f32 %v103_v52, 0.0  ;;  %v73_v3 = vadd.f32 %v228_v2, %v50_v54  ;;  %v90_v4 = vld [vmem:[%s370_s3 + $0x50] sm:$0xff]  ;;  %v91_v5 = vld [vmem:[%s370_s3 + $0x58] sm:$0xff]  ;;  %v53_v6 = vmul.f32 %v223_v1, %v30_v49 }
   0xe   :  { %132 = vst [vmem:[#allocation2 + $0x20] sm:$0xff] %v116_v50  ;;  %133 = vst [vmem:[#allocation2 + $0x28] sm:$0xff] %v117_v57  ;;  %v104_v7 = vadd.f32 %v88_v53, %v72_v58  ;;  %v74_v8 = vadd.f32 %v228_v2, %v51_v59  ;;  %v75_v9 = vadd.f32 %v228_v2, %v52_v60  ;;  %v92_v10 = vld [vmem:[%s370_s3 + $0x60] sm:$0xff]  ;;  %v93_v14 = vld [vmem:[%s370_s3 + $0x68] sm:$0xff]  ;;  %s189_s1 = smov [#allocation2]  }
   0xf   :  { %v54_v11 = vmul.f32 %v223_v1, %v31_v56  ;;  %134 = vst [vmem:[#allocation2 + $0x30] sm:$0xff] %v118_v63  ;;  %135 = vst [vmem:[#allocation2 + $0x38] sm:$0xff] %v119_v0  ;;  %v105_v12 = vadd.f32 %v89_v55, %v73_v3  ;;  %v76_v13 = vadd.f32 %v228_v2, %v53_v6  ;;  %v94_v21 = vld [vmem:[%s370_s3 + $0x70] sm:$0xff]  ;;  %v95_v22 = vld [vmem:[%s370_s3 + $0x78] sm:$0xff]  ;;  %s149_s26 = sshll.u32 %s189_s1, 4  ;;  %s150_s26 = int_to_ptr.vmem [resolvable:$true] %s149_s26 }
  0x10   :  { %v55_v15 = vmul.f32 %v223_v1, %v32_v61  ;;  %v56_v16 = vmul.f32 %v223_v1, %v33_v62  ;;  %v120_v17 = vmax.f32 %v104_v7, 0.0  ;;  %v106_v18 = vadd.f32 %v90_v4, %v74_v8  ;;  %s165_s3 = scalar_lea.vmem %s150_s26, 2048  ;;  %p170_p1 = scmp.lt.s32.totalorder %s150_s26, %s150_s26 }
  0x11   :  { %v107_v19 = vadd.f32 %v91_v5, %v75_v9  ;;  %v77_v20 = vadd.f32 %v228_v2, %v54_v11  ;;  %v121_v23 = vmax.f32 %v105_v12, 0.0  ;;  %v108_v24 = vadd.f32 %v92_v10, %v76_v13  ;;  %p166_p0 = scmp.ne.s32.totalorder %s150_s26, %s165_s3  ;;  %p171_p2 = scmp.lt.s32.totalorder %s165_s3, %s165_s3 }
  0x12   :  { %v78_v25 = vadd.f32 %v228_v2, %v55_v15  ;;  %v79_v26 = vadd.f32 %v228_v2, %v56_v16  ;;  %136 = vst [vmem:[#allocation2 + $0x40] sm:$0xff] %v120_v17  ;;  %v122_v1 = vmax.f32 %v106_v18, 0.0 }
  0x13   :  { %v123_v27 = vmax.f32 %v107_v19, 0.0  ;;  %v109_v28 = vadd.f32 %v93_v14, %v77_v20  ;;  %137 = vst [vmem:[#allocation2 + $0x48] sm:$0xff] %v121_v23  ;;  %v124_v29 = vmax.f32 %v108_v24, 0.0  ;;  %p172_p3 = por %p171_p2, %p170_p1 }
  0x14   :  { %v110_v30 = vadd.f32 %v94_v21, %v78_v25  ;;  %v111_v31 = vadd.f32 %v95_v22, %v79_v26  ;;  %138 = vst [vmem:[#allocation2 + $0x50] sm:$0xff] %v122_v1 }
  0x15   :  { %139 = vst [vmem:[#allocation2 + $0x58] sm:$0xff] %v123_v27  ;;  %v125_v32 = vmax.f32 %v109_v28, 0.0  ;;  %140 = vst [vmem:[#allocation2 + $0x60] sm:$0xff] %v124_v29  ;;  %p173_p4 = pnand %p172_p3, %p166_p0 }
  0x16   :  { %v126_v33 = vmax.f32 %v110_v30, 0.0  ;;  %v127_v34 = vmax.f32 %v111_v31, 0.0 }
  0x17   :  { %141 = vst [vmem:[#allocation2 + $0x68] sm:$0xff] %v125_v32 }
  0x18   :  { %142 = vst [vmem:[#allocation2 + $0x70] sm:$0xff] %v126_v33  ;;  %143 = vst [vmem:[#allocation2 + $0x78] sm:$0xff] %v127_v34 }
  0x19   :  { %176 = shalt.err (!%p173_p4)
}
  0x1a   :  { %s177_s28 = scalar_lea.hbm %s371_s4, 2048 }
  0x1b   :  { %p178_p5 = scmp.ne.s32.totalorder %s371_s4, %s177_s28  ;;  %p181_p6 = scmp.lt.u32.totalorder %s177_s28, %s371_s4 }
  0x1d   :  { %p183_p7 = pnand %p181_p6, %p178_p5 }
  0x1f   :  { %186 = shalt.err (!%p183_p7)
}
  0x20   :  { %s190_s7 = smov 128   ;;  %s191_s8 = smov 8  }
  0x21   :  { %155 = dma.vmem_to_hbm [thread:$0]  %s150_s26, 2048, %s371_s4, [#allocation3], %s190_s7, %s190_s7, %s191_s8  }
  0x22   :  { %187 = dma.done.wait [#allocation3], 2048  }
  0x23   :  { %188 = vsyncadd [#allocation3], 4294965248 }
  0x24   :  { %159 = vsyncpa [#allocation3], 1 }

// kernel: resblock_forward.6
= control target key start
LH: loop header
LB: loop body
LE: loop exit
PB: predicated region body
PF: predicated region fallthrough
CT: control target
= control target key end

     0   :  { %vm332_vm0 = vcmask 1040384   ;;  %s700_s3 = inlined_call_operand.vmem [shape: f32[128,128], index: 3, kind: input, shape index: {}]   ;;  %s701_s0 = inlined_call_operand.vmem [shape: f32[128,128], index: 0, kind: input, shape index: {}]   ;;  %s702_s1 = inlined_call_operand.vmem [shape: f32[1,128], index: 1, kind: input, shape index: {}]   ;;  %s703_s2 = inlined_call_operand.vmem [shape: f32[1,128], index: 2, kind: input, shape index: {}]   ;;  %s704_s4 = inlined_call_operand.vmem [shape: f32[128,128], index: 4, kind: output, shape index: {0}]   ;;  %s705_s5 = inlined_call_operand.vmem [shape: f32[1,2,128], index: 5, kind: output, shape index: {1}]  }
   0x1   :  { %v97_v0 = vld [vmem:[%s700_s3] sm:$0xff]  ;;  %v98_v1 = vld [vmem:[%s700_s3 + $0x8] sm:$0xff]  ;;  %v99_v2 = vld [vmem:[%s700_s3 + $0x10] sm:$0xff] }
   0x2   :  { %v433_v3 = vpack.c.bf16 %v98_v1, %v97_v0  ;;  %v100_v4 = vld [vmem:[%s700_s3 + $0x18] sm:$0xff]  ;;  %v101_v6 = vld [vmem:[%s700_s3 + $0x20] sm:$0xff]  ;;  %v102_v7 = vld [vmem:[%s700_s3 + $0x28] sm:$0xff] }
   0x3   :  { %v437_v5 = vpack.c.bf16 %v100_v4, %v99_v2  ;;  %v441_v8 = vpack.c.bf16 %v102_v7, %v101_v6  ;;  %v19_v9 = vld [vmem:[%s701_s0] sm:$0xff]  ;;  %v103_v11 = vld [vmem:[%s700_s3 + $0x30] sm:$0xff]  ;;  %v104_v12 = vld [vmem:[%s700_s3 + $0x38] sm:$0xff] }
   0x4   :  { %434 = vmatprep.subr.bf16.mxu0 %v433_v3  ;;  %465 = vmatprep.subr.bf16.mxu1 %v433_v3  ;;  %v535_v10 = vld [vmem:[%s702_s1] ss:$0 sm:$0xff]  ;;  %v445_v16 = vpack.c.bf16 %v104_v12, %v103_v11  ;;  %v106_v19 = vld [vmem:[%s700_s3 + $0x48] sm:$0xff]  ;;  %v107_v23 = vld [vmem:[%s700_s3 + $0x50] sm:$0xff] }
   0x5   :  { %436 = vmatpush3.bf16.msra.mxu0 %v433_v3  ;;  %473 = vmatpush3.bf16.msra.mxu1 %v433_v3  ;;  %v42_v13 = vmul.f32 %v535_v10, %v19_v9  ;;  %v547_v14 = vld [vmem:[%s703_s2] ss:$0 sm:$0xff]  ;;  %v108_v24 = vld [vmem:[%s700_s3 + $0x58] sm:$0xff]  ;;  %v110_v29 = vld [vmem:[%s700_s3 + $0x68] sm:$0xff] }
   0x6   :  { %438 = vmatprep.subr.bf16.mxu0 %v437_v5  ;;  %466 = vmatprep.subr.bf16.mxu1 %v437_v5  ;;  %v27_v17 = vld [vmem:[%s701_s0 + $0x40] sm:$0xff]  ;;  %v453_v27 = vpack.c.bf16 %v108_v24, %v107_v23  ;;  %v20_v30 = vld [vmem:[%s701_s0 + $0x8] sm:$0xff]  ;;  %v21_v33 = vld [vmem:[%s701_s0 + $0x10] sm:$0xff] }
   0x7   :  { %v65_v15 = vadd.f32 %v547_v14, %v42_v13  ;;  %v105_v18 = vld [vmem:[%s700_s3 + $0x40] sm:$0xff]  ;;  %v50_v21 = vmul.f32 %v535_v10, %v27_v17  ;;  %v28_v31 = vld [vmem:[%s701_s0 + $0x48] sm:$0xff]  ;;  %v29_v34 = vld [vmem:[%s701_s0 + $0x50] sm:$0xff]  ;;  %v43_v37 = vmul.f32 %v535_v10, %v20_v30  ;;  %v44_v41 = vmul.f32 %v535_v10, %v21_v33 }
   0x8   :  { %v449_v22 = vpack.c.bf16 %v106_v19, %v105_v18  ;;  %v109_v28 = vld [vmem:[%s700_s3 + $0x60] sm:$0xff]  ;;  %v111_v35 = vld [vmem:[%s700_s3 + $0x70] sm:$0xff]  ;;  %v112_v36 = vld [vmem:[%s700_s3 + $0x78] sm:$0xff]  ;;  %v51_v40 = vmul.f32 %v535_v10, %v28_v31  ;;  %v52_v42 = vmul.f32 %v535_v10, %v29_v34 }
   0x9   :  { %440 = vmatpush3.bf16.msra.mxu0 %v437_v5  ;;  %474 = vmatpush3.bf16.msra.mxu1 %v437_v5  ;;  %v81_v20 = vmax.f32 %v65_v15, 0.0  ;;  %v73_v25 = vadd.f32 %v547_v14, %v50_v21  ;;  %v457_v32 = vpack.c.bf16 %v110_v29, %v109_v28  ;;  %v22_v38 = vld [vmem:[%s701_s0 + $0x18] sm:$0xff]  ;;  %v23_v39 = vld [vmem:[%s701_s0 + $0x20] sm:$0xff]  ;;  %v461_v44 = vpack.c.bf16 %v112_v36, %v111_v35  ;;  %v24_v49 = vld [vmem:[%s701_s0 + $0x28] sm:$0xff] }
   0xa   :  { %442 = vmatprep.subr.bf16.mxu0 %v441_v8  ;;  %467 = vmatprep.subr.bf16.mxu1 %v441_v8  ;;  %v30_v43 = vld [vmem:[%s701_s0 + $0x58] sm:$0xff]  ;;  %v31_v45 = vld [vmem:[%s701_s0 + $0x60] sm:$0xff]  ;;  %v45_v46 = vmul.f32 %v535_v10, %v22_v38  ;;  %v46_v47 = vmul.f32 %v535_v10, %v23_v39  ;;  %v66_v48 = vadd.f32 %v547_v14, %v43_v37  ;;  %v25_v50 = vld [vmem:[%s701_s0 + $0x30] sm:$0xff] }
   0xb   :  { %409 = vmatprep.mubr.f32.mxu0 %v81_v20  ;;  %v89_v26 = vmax.f32 %v73_v25, 0.0  ;;  %v74_v51 = vadd.f32 %v547_v14, %v51_v40  ;;  %v53_v52 = vmul.f32 %v535_v10, %v30_v43  ;;  %v67_v53 = vadd.f32 %v547_v14, %v44_v41  ;;  %v32_v56 = vld [vmem:[%s701_s0 + $0x68] sm:$0xff]  ;;  %v33_v57 = vld [vmem:[%s701_s0 + $0x70] sm:$0xff]  ;;  %v26_v63 = vld [vmem:[%s701_s0 + $0x38] sm:$0xff] }
   0xc   :  { %v75_v54 = vadd.f32 %v547_v14, %v52_v42  ;;  %v54_v55 = vmul.f32 %v535_v10, %v31_v45  ;;  %v68_v58 = vadd.f32 %v547_v14, %v45_v46  ;;  %v69_v59 = vadd.f32 %v547_v14, %v46_v47  ;;  %v34_v7 = vld [vmem:[%s701_s0 + $0x78] sm:$0xff] }
   0xd   :  { %444 = vmatpush3.bf16.msra.mxu0 %v441_v8  ;;  %475 = vmatpush3.bf16.msra.mxu1 %v441_v8  ;;  %v47_v60 = vmul.f32 %v535_v10, %v24_v49  ;;  %v48_v61 = vmul.f32 %v535_v10, %v25_v50  ;;  %v82_v62 = vmax.f32 %v66_v48, 0.0  ;;  %v90_v0 = vmax.f32 %v74_v51, 0.0 }
   0xe   :  { %446 = vmatprep.subr.bf16.mxu0 %v445_v16  ;;  %468 = vmatprep.subr.bf16.mxu1 %v445_v16  ;;  %v76_v1 = vadd.f32 %v547_v14, %v53_v52  ;;  %v55_v2 = vmul.f32 %v535_v10, %v32_v56  ;;  %v83_v3 = vmax.f32 %v67_v53, 0.0  ;;  %v91_v4 = vmax.f32 %v75_v54, 0.0 }
   0xf   :  { %421 = vmatprep.mubr.f32.mxu1 %v89_v26  ;;  %v77_v5 = vadd.f32 %v547_v14, %v54_v55  ;;  %v56_v6 = vmul.f32 %v535_v10, %v33_v57  ;;  %v70_v8 = vadd.f32 %v547_v14, %v47_v60  ;;  %v49_v9 = vmul.f32 %v535_v10, %v26_v63 }
  0x10   :  { %v84_v11 = vmax.f32 %v68_v58, 0.0  ;;  %v92_v12 = vmax.f32 %v76_v1, 0.0  ;;  %v78_v13 = vadd.f32 %v547_v14, %v55_v2  ;;  %v57_v15 = vmul.f32 %v535_v10, %v34_v7 }
  0x11   :  { %448 = vmatpush3.bf16.msra.mxu0 %v445_v16  ;;  %476 = vmatpush3.bf16.msra.mxu1 %v445_v16  ;;  %v85_v16 = vmax.f32 %v69_v59, 0.0  ;;  %v71_v17 = vadd.f32 %v547_v14, %v48_v61  ;;  %v93_v18 = vmax.f32 %v77_v5, 0.0  ;;  %v79_v19 = vadd.f32 %v547_v14, %v56_v6 }
  0x12   :  { %450 = vmatprep.subr.bf16.mxu0 %v449_v22  ;;  %469 = vmatprep.subr.bf16.mxu1 %v449_v22  ;;  %v86_v20 = vmax.f32 %v70_v8, 0.0  ;;  %v72_v21 = vadd.f32 %v547_v14, %v49_v9  ;;  %v80_v23 = vadd.f32 %v547_v14, %v57_v15 }
  0x13   :  { %v87_v24 = vmax.f32 %v71_v17, 0.0  ;;  %v95_v10 = vmax.f32 %v79_v19, 0.0 }
  0x14   :  { %v88_v25 = vmax.f32 %v72_v21, 0.0  ;;  %v96_v26 = vmax.f32 %v80_v23, 0.0 }
  0x15   :  { %452 = vmatpush3.bf16.msra.mxu0 %v449_v22  ;;  %477 = vmatpush3.bf16.msra.mxu1 %v449_v22  ;;  %v94_v22 = vmax.f32 %v78_v13, 0.0 }
  0x16   :  { %454 = vmatprep.subr.bf16.mxu0 %v453_v27  ;;  %470 = vmatprep.subr.bf16.mxu1 %v453_v27 }
  0x19   :  { %456 = vmatpush3.bf16.msra.mxu0 %v453_v27  ;;  %478 = vmatpush3.bf16.msra.mxu1 %v453_v27 }
  0x1a   :  { %458 = vmatprep.subr.bf16.mxu0 %v457_v32  ;;  %471 = vmatprep.subr.bf16.mxu1 %v457_v32 }
  0x1d   :  { %460 = vmatpush3.bf16.msra.mxu0 %v457_v32  ;;  %479 = vmatpush3.bf16.msra.mxu1 %v457_v32 }
  0x1e   :  { %462 = vmatprep.subr.bf16.mxu0 %v461_v44  ;;  %472 = vmatprep.subr.bf16.mxu1 %v461_v44 }
  0x21   :  { %464 = vmatpush3.bf16.msra.mxu0 %v461_v44  ;;  %480 = vmatpush3.bf16.msra.mxu1 %v461_v44 }
  0x24   :  { %410 = vmatmul.mubr.f32.vlgmr.msra.gmra.mrb[0].mxu0 %v82_v62  ;;  %422 = vmatmul.mubr.f32.vlgmr.msra.gmra.mrb[0].mxu1 %v90_v0 }
  0x25   :  { %412 = vmatprep.mubr.f32.mxu0 %v83_v3  ;;  %424 = vmatprep.mubr.f32.mxu1 %v91_v4 }
  0x28   :  { %413 = vmatmul.mubr.f32.gmra.mrb[2].mxu0 %v84_v11  ;;  %425 = vmatmul.mubr.f32.gmra.mrb[2].mxu1 %v92_v12 }
  0x29   :  { %415 = vmatprep.mubr.f32.mxu0 %v85_v16  ;;  %427 = vmatprep.mubr.f32.mxu1 %v93_v18 }
  0x2c   :  { %416 = vmatmul.mubr.f32.gmra.mrb[4].mxu0 %v86_v20  ;;  %428 = vmatmul.mubr.f32.gmra.mrb[4].mxu1 %v94_v22 }
  0x2d   :  { %418 = vmatprep.mubr.f32.mxu0 %v87_v24  ;;  %430 = vmatprep.mubr.f32.mxu1 %v95_v10 }
  0x30   :  { %419 = vmatmul.mubr.f32.gmra.mrb[6].mxu0 %v88_v25  ;;  %431 = vmatmul.mubr.f32.gmra.mrb[6].mxu1 %v96_v26 }
  0xf7   :  { %v411_v27 = vpop.f32.mrb[0].mxu0  ;;  %v423_v28 = vpop.f32.mrb[0].mxu1 }
  0xf8   :  { %259 = vst [vmem:[%s704_s4 + $0x8] sm:$0xff] %v411_v27  ;;  %v296_v29 = vmul.f32 %v411_v27, %v411_v27  ;;  %v179_v14 = vpop.f32.mrb[1].mxu0  ;;  %267 = vst [vmem:[%s704_s4 + $0x48] sm:$0xff] %v423_v28  ;;  %v219_v30 = vpop.f32.mrb[1].mxu1  ;;  %v304_v2 = vmul.f32 %v423_v28, %v423_v28 }
  0xf9   :  { %258 = vst [vmem:[%s704_s4] sm:$0xff] %v179_v14  ;;  %v274_v31 = vadd.f32 %v411_v27, %v179_v14  ;;  %v295_v32 = vmul.f32 %v179_v14, %v179_v14  ;;  %266 = vst [vmem:[%s704_s4 + $0x40] sm:$0xff] %v219_v30  ;;  %v303_v63 = vmul.f32 %v219_v30, %v219_v30 }
  0xfb   :  { %v311_v33 = vadd.f32 %v296_v29, %v295_v32  ;;  %v414_v34 = vpop.f32.mrb[2].mxu0  ;;  %v426_v35 = vpop.f32.mrb[2].mxu1 }
  0xfc   :  { %261 = vst [vmem:[%s704_s4 + $0x18] sm:$0xff] %v414_v34  ;;  %v189_v36 = vpop.f32.mrb[3].mxu0  ;;  %269 = vst [vmem:[%s704_s4 + $0x58] sm:$0xff] %v426_v35  ;;  %v229_v37 = vpop.f32.mrb[3].mxu1  ;;  %v298_v40 = vmul.f32 %v414_v34, %v414_v34  ;;  %v306_v8 = vmul.f32 %v426_v35, %v426_v35 }
  0xfd   :  { %260 = vst [vmem:[%s704_s4 + $0x10] sm:$0xff] %v189_v36  ;;  %v275_v38 = vadd.f32 %v274_v31, %v189_v36  ;;  %v297_v39 = vmul.f32 %v189_v36, %v189_v36  ;;  %268 = vst [vmem:[%s704_s4 + $0x50] sm:$0xff] %v229_v37  ;;  %v305_v5 = vmul.f32 %v229_v37, %v229_v37 }
  0xff   :  { %v312_v41 = vadd.f32 %v311_v33, %v297_v39  ;;  %v417_v42 = vpop.f32.mrb[4].mxu0  ;;  %v276_v43 = vadd.f32 %v414_v34, %v275_v38  ;;  %v429_v44 = vpop.f32.mrb[4].mxu1 }
 0x100   :  { %263 = vst [vmem:[%s704_s4 + $0x28] sm:$0xff] %v417_v42  ;;  %v199_v45 = vpop.f32.mrb[5].mxu0  ;;  %271 = vst [vmem:[%s704_s4 + $0x68] sm:$0xff] %v429_v44  ;;  %v239_v46 = vpop.f32.mrb[5].mxu1  ;;  %v300_v50 = vmul.f32 %v417_v42, %v417_v42  ;;  %v308_v16 = vmul.f32 %v429_v44, %v429_v44 }
 0x101   :  { %262 = vst [vmem:[%s704_s4 + $0x20] sm:$0xff] %v199_v45  ;;  %v277_v47 = vadd.f32 %v276_v43, %v199_v45  ;;  %v299_v48 = vmul.f32 %v199_v45, %v199_v45  ;;  %v313_v49 = vadd.f32 %v312_v41, %v298_v40  ;;  %270 = vst [vmem:[%s704_s4 + $0x60] sm:$0xff] %v239_v46 }
 0x102   :  { %v307_v12 = vmul.f32 %v239_v46, %v239_v46 }
 0x103   :  { %v314_v51 = vadd.f32 %v313_v49, %v299_v48  ;;  %v420_v52 = vpop.f32.mrb[6].mxu0  ;;  %v278_v53 = vadd.f32 %v417_v42, %v277_v47  ;;  %v432_v54 = vpop.f32.mrb[6].mxu1 }
 0x104   :  { %265 = vst [vmem:[%s704_s4 + $0x38] sm:$0xff] %v420_v52  ;;  %v209_v55 = vpop.f32.mrb[7].mxu0  ;;  %273 = vst [vmem:[%s704_s4 + $0x78] sm:$0xff] %v432_v54  ;;  %v249_v56 = vpop.f32.mrb[7].mxu1  ;;  %v302_v60 = vmul.f32 %v420_v52, %v420_v52  ;;  %v310_v22 = vmul.f32 %v432_v54, %v432_v54 }
 0x105   :  { %264 = vst [vmem:[%s704_s4 + $0x30] sm:$0xff] %v209_v55  ;;  %v279_v57 = vadd.f32 %v278_v53, %v209_v55  ;;  %v301_v58 = vmul.f32 %v209_v55, %v209_v55  ;;  %v315_v59 = vadd.f32 %v314_v51, %v300_v50  ;;  %272 = vst [vmem:[%s704_s4 + $0x70] sm:$0xff] %v249_v56 }
 0x106   :  { %v309_v19 = vmul.f32 %v249_v56, %v249_v56 }
 0x107   :  { %v280_v61 = vadd.f32 %v420_v52, %v279_v57  ;;  %v316_v62 = vadd.f32 %v315_v59, %v301_v58 }
 0x109   :  { %v317_v0 = vadd.f32 %v316_v62, %v302_v60  ;;  %v281_v1 = vadd.f32 %v280_v61, %v219_v30 }
 0x10b   :  { %v318_v3 = vadd.f32 %v317_v0, %v303_v63  ;;  %v282_v4 = vadd.f32 %v423_v28, %v281_v1 }
 0x10d   :  { %v283_v6 = vadd.f32 %v282_v4, %v229_v37  ;;  %v319_v7 = vadd.f32 %v318_v3, %v304_v2 }
 0x10f   :  { %v320_v9 = vadd.f32 %v319_v7, %v305_v5  ;;  %v284_v11 = vadd.f32 %v426_v35, %v283_v6 }
 0x111   :  { %v285_v13 = vadd.f32 %v284_v11, %v239_v46  ;;  %v321_v15 = vadd.f32 %v320_v9, %v306_v8 }
 0x113   :  { %v322_v17 = vadd.f32 %v321_v15, %v307_v12  ;;  %v286_v18 = vadd.f32 %v429_v44, %v285_v13 }
 0x115   :  { %v287_v20 = vadd.f32 %v286_v18, %v249_v56  ;;  %v323_v21 = vadd.f32 %v322_v17, %v308_v16 }
 0x117   :  { %v288_v23 = vadd.f32 %v432_v54, %v287_v20  ;;  %v324_v24 = vadd.f32 %v323_v21, %v309_v19 }
 0x119   :  { %v289_v10 = vrot.slane %v288_v23, 4  ;;  %v325_v25 = vadd.f32 %v324_v24, %v310_v22 }
 0x11b   :  { %v290_v26 = vadd.f32 %v289_v10, %v288_v23  ;;  %v326_v27 = vrot.slane %v325_v25, 4 }
 0x11d   :  { %v291_v28 = vrot.slane %v290_v26, 2  ;;  %v327_v29 = vadd.f32 %v326_v27, %v325_v25 }
 0x11f   :  { %v292_v14 = vadd.f32 %v291_v28, %v290_v26  ;;  %v328_v30 = vrot.slane %v327_v29, 2 }
 0x121   :  { %v293_v31 = vrot.slane %v292_v14, 1  ;;  %v329_v32 = vadd.f32 %v328_v30, %v327_v29 }
 0x123   :  { %v330_v33 = vrot.slane %v329_v32, 1  ;;  %v294_v34 = vadd.f32 %v293_v31, %v292_v14 }
 0x125   :  { %v331_v35 = vadd.f32 %v330_v33, %v329_v32 }
 0x127   :  { %v333_v36 = vsel %vm332_vm0, %v294_v34, %v331_v35 }
 0x128   :  { %334 = vst [vmem:[%s705_s5] sm:$0x3] %v333_v36 }

// kernel: resblock_forward.5
= control target key start
LH: loop header
LB: loop body
LE: loop exit
PB: predicated region body
PF: predicated region fallthrough
CT: control target
= control target key end

     0   :  { %s2952_s18 = smov 0   ;;  %s3790_s0 = inlined_call_operand.vmem [shape: f32[2,10,10,128], index: 0, kind: input, shape index: {}]   ;;  %s3791_s1 = inlined_call_operand.vmem [shape: f32[1,128], index: 1, kind: input, shape index: {}]   ;;  %s3792_s2 = inlined_call_operand.vmem [shape: f32[1,128], index: 2, kind: input, shape index: {}]   ;;  %s3793_s3 = inlined_call_operand.vmem [shape: f32[9,128,128], index: 3, kind: input, shape index: {}]   ;;  %s3794_s4 = inlined_call_operand.vmem [shape: f32[2,64,128], index: 4, kind: output, shape index: {0}]   ;;  %s3795_s5 = inlined_call_operand.vmem [shape: f32[2,2,128], index: 5, kind: output, shape index: {1}]  }
   0x1 LB: > { %s1759_s19 = sadd.s32 4294967295, %s2919_s18   ;;  %p1763_p0 = scmp.ge.s32.totalorder %s2919_s18, 1  ;;  %s2919_s18 = sphi %s2952_s18, %s16_s18  }
   0x2   : > { %p190_p1 = scmp.lt.s32.totalorder %s2919_s18, 3 }
   0x4   : > { %p191_p2 = pnand %p1763_p0, %p190_p1 }
   0x5   : > { %v1770_v0 = vld [vmem:[%s3793_s3 + $0x80] sm:$0xff] (!%p191_p2)  ;;  %v1771_v1 = vld [vmem:[%s3793_s3 + $0x88] sm:$0xff] (!%p191_p2)  ;;  %p222_p3 = scmp.lt.s32.totalorder (!%p191_p2), %s1759_s19, 1  ;;  %v1772_v5 = vld [vmem:[%s3793_s3 + $0x90] sm:$0xff] (!%p191_p2)  ;;  %v2921_v7 = vmov (!%p191_p2), 0.0   ;;  %v330_v18 = vlaneseq (!%p191_p2)  ;;  %vm405_vm2 = vcmask (!%p191_p2), 1046528  }
   0x6   : > { %194 = sbr.rel (%p191_p2) target bundleno = 416 (0x1a0), region = 36  ;;  %v1833_v2 = vld [vmem:[%s3793_s3 + $0x200] sm:$0xff] (!%p191_p2)  ;;  %v2535_v3 = vpack.c.bf16 (!%p191_p2), %v1771_v1, %v1770_v0  ;;  %v1834_v4 = vld [vmem:[%s3793_s3 + $0x208] sm:$0xff] (!%p191_p2)  ;;  %v1773_v6 = vld [vmem:[%s3793_s3 + $0x98] sm:$0xff] (!%p191_p2)  ;;  %v2979_v8 = vrot.slane (!%p191_p2), %v2921_v7, 1  ;;  %vm665_vm3 = vcmask (!%p191_p2), 1045504  }
   0x7   : > { %v2663_v9 = vpack.c.bf16 (!%p191_p2), %v1834_v4, %v1833_v2  ;;  %v2539_v10 = vpack.c.bf16 (!%p191_p2), %v1773_v6, %v1772_v5  ;;  %v1835_v11 = vld [vmem:[%s3793_s3 + $0x210] sm:$0xff] (!%p191_p2)  ;;  %v1836_v12 = vld [vmem:[%s3793_s3 + $0x218] sm:$0xff] (!%p191_p2)  ;;  %v1774_v13 = vld [vmem:[%s3793_s3 + $0xa0] sm:$0xff] (!%p191_p2)  ;;  %v3020_v25 = vshrl.u32 (!%p191_p2), %v330_v18, 7  ;;  %vm1670_vm4 = vcmask (!%p191_p2), 1040384  }
   0x8   : > { %2536 = vmatprep.subr.bf16.mxu1 (!%p191_p2), %v2535_v3  ;;  %v2667_v14 = vpack.c.bf16 (!%p191_p2), %v1836_v12, %v1835_v11  ;;  %v1775_v15 = vld [vmem:[%s3793_s3 + $0xa8] sm:$0xff] (!%p191_p2)  ;;  %v1837_v16 = vld [vmem:[%s3793_s3 + $0x220] sm:$0xff] (!%p191_p2)  ;;  %2171 = vmatprep.mubr.f32.mxu1 (!%p191_p2), %v2979_v8  ;;  %v1776_v21 = vld [vmem:[%s3793_s3 + $0xb0] sm:$0xff] (!%p191_p2) }
   0x9   : > { %v1838_v17 = vld [vmem:[%s3793_s3 + $0x228] sm:$0xff] (!%p191_p2)  ;;  %2664 = vmatprep.subr.bf16.mxu0 (!%p191_p2), %v2663_v9  ;;  %2538 = vmatpush3.bf16.msra.mxu1 (!%p191_p2), %v2535_v3  ;;  %v2543_v19 = vpack.c.bf16 (!%p191_p2), %v1775_v15, %v1774_v13  ;;  %v1777_v22 = vld [vmem:[%s3793_s3 + $0xb8] sm:$0xff] (!%p191_p2)  ;;  %v1839_v23 = vld [vmem:[%s3793_s3 + $0x230] sm:$0xff] (!%p191_p2)  ;;  %v3047_v36 = vadd.s32 (!%p191_p2), 8, %v3020_v25  ;;  %vm333_vm0 = vcmp.ge.s32.totalorder (!%p191_p2), %v3020_v25, 1 }
   0xa   : > { %2666 = vmatpush3.bf16.msra.mxu0 (!%p191_p2), %v2663_v9  ;;  %2540 = vmatprep.subr.bf16.mxu1 (!%p191_p2), %v2539_v10  ;;  %v2671_v20 = vpack.c.bf16 (!%p191_p2), %v1838_v17, %v1837_v16  ;;  %v1840_v24 = vld [vmem:[%s3793_s3 + $0x238] sm:$0xff] (!%p191_p2)  ;;  %v2547_v26 = vpack.c.bf16 (!%p191_p2), %v1777_v22, %v1776_v21  ;;  %v1778_v28 = vld [vmem:[%s3793_s3 + $0xc0] sm:$0xff] (!%p191_p2)  ;;  %v1779_v29 = vld [vmem:[%s3793_s3 + $0xc8] sm:$0xff] (!%p191_p2) }
   0xb   : > { %2668 = vmatprep.subr.bf16.mxu0 (!%p191_p2), %v2667_v14  ;;  %v2675_v27 = vpack.c.bf16 (!%p191_p2), %v1840_v24, %v1839_v23  ;;  %v1841_v30 = vld [vmem:[%s3793_s3 + $0x240] sm:$0xff] (!%p191_p2)  ;;  %v1842_v31 = vld [vmem:[%s3793_s3 + $0x248] sm:$0xff] (!%p191_p2)  ;;  %v2551_v37 = vpack.c.bf16 (!%p191_p2), %v1779_v29, %v1778_v28  ;;  %v1780_v43 = vld [vmem:[%s3793_s3 + $0xd0] sm:$0xff] (!%p191_p2)  ;;  %vm340_vm1 = vcmp.le.s32.totalorder (!%p191_p2), %v3047_v36, 8 }
   0xc   : > { %v3039_v34 = vld [vmem:[%s3791_s1] ss:$0 sm:$0xff] (!%p191_p2)  ;;  %v2679_v42 = vpack.c.bf16 (!%p191_p2), %v1842_v31, %v1841_v30  ;;  %v1781_v44 = vld [vmem:[%s3793_s3 + $0xd8] sm:$0xff] (!%p191_p2)  ;;  %v1843_v47 = vld [vmem:[%s3793_s3 + $0x250] sm:$0xff] (!%p191_p2) }
   0xd   : > { %s3797_s19 = smov (!%p222_p3, %s1759_s19), 1  ;;  %2542 = vmatpush3.bf16.msra.mxu1 %v2539_v10  ;;  %v3044_v35 = vld [vmem:[%s3792_s2] ss:$0 sm:$0xff]  ;;  %v1844_v48 = vld [vmem:[%s3793_s3 + $0x258] sm:$0xff]  ;;  %v2555_v53 = vpack.c.bf16 %v1781_v44, %v1780_v43  ;;  %v1783_v55 = vld [vmem:[%s3793_s3 + $0xe8] sm:$0xff] }
   0xe   : > { %s2903_s21 = smul.u32 160, %s3797_s19  ;;  %2670 = vmatpush3.bf16.msra.mxu0 %v2667_v14  ;;  %2544 = vmatprep.subr.bf16.mxu1 %v2543_v19  ;;  %v1782_v54 = vld [vmem:[%s3793_s3 + $0xe0] sm:$0xff]  ;;  %v2683_v59 = vpack.c.bf16 %v1844_v48, %v1843_v47  ;;  %v1846_v60 = vld [vmem:[%s3793_s3 + $0x268] sm:$0xff]  ;;  %v1784_v61 = vld [vmem:[%s3793_s3 + $0xf0] sm:$0xff]  ;;  %s1922_s17 = sshll.u32 %s3797_s19, 6 }
   0xf   : > { %2672 = vmatprep.subr.bf16.mxu0 %v2671_v20  ;;  %v1845_v56 = vld [vmem:[%s3793_s3 + $0x260] sm:$0xff]  ;;  %v1785_v62 = vld [vmem:[%s3793_s3 + $0xf8] sm:$0xff]  ;;  %v1847_v0 = vld [vmem:[%s3793_s3 + $0x270] sm:$0xff]  ;;  %v2559_v12 = vpack.c.bf16 %v1783_v55, %v1782_v54  ;;  %s1767_s22 = sshll.u32 %s3797_s19, 1 }
  0x10   : > { %s3018_s7 = scalar_lea.vmem %s3790_s0, %s2903_s21  ;;  %v1848_v1 = vld [vmem:[%s3793_s3 + $0x278] sm:$0xff]  ;;  %v373_v5 = vld [vmem:[%s3793_s3] sm:$0xff]  ;;  %v374_v6 = vld [vmem:[%s3793_s3 + $0x8] sm:$0xff]  ;;  %v2687_v13 = vpack.c.bf16 %v1846_v60, %v1845_v56  ;;  %v3119_v14 = vpack.c.bf16 %v1785_v62, %v1784_v61  ;;  %s235_s25 = scalar_lea.vmem %s3795_s5, %s1767_s22 }
  0x11   : > { %v238_v32 = vld [vmem:[%s3018_s7 + $0x10] sm:$0xff]  ;;  %v239_v33 = vld [vmem:[%s3018_s7 + $0x18] sm:$0x3]  ;;  %2546 = vmatpush3.bf16.msra.mxu1 %v2543_v19  ;;  %v240_v40 = vld [vmem:[%s3018_s7 + $0x20] sm:$0xff]  ;;  %v3128_v18 = vpack.c.bf16 %v1848_v1, %v1847_v0  ;;  %v3141_v24 = vpack.c.bf16 %v374_v6, %v373_v5 }
  0x12   : > { %2674 = vmatpush3.bf16.msra.mxu0 %v2671_v20  ;;  %2548 = vmatprep.subr.bf16.mxu1 %v2547_v26  ;;  %v266_v38 = vmul.f32 %v3039_v34, %v238_v32  ;;  %v267_v39 = vmul.f32 %v3039_v34, %v239_v33  ;;  %v241_v41 = vld [vmem:[%s3018_s7 + $0x28] sm:$0x3]  ;;  %v268_v45 = vmul.f32 %v3039_v34, %v240_v40  ;;  %v242_v11 = vld [vmem:[%s3018_s7 + $0x30] sm:$0xff]  ;;  %v1849_v15 = vld [vmem:[%s3793_s3 + $0x280] sm:$0xff] }
  0x13   : > { %2676 = vmatprep.subr.bf16.mxu0 %v2675_v27  ;;  %v269_v46 = vmul.f32 %v3039_v34, %v241_v41  ;;  %v1850_v16 = vld [vmem:[%s3793_s3 + $0x288] sm:$0xff]  ;;  %v243_v17 = vld [vmem:[%s3018_s7 + $0x38] sm:$0x3]  ;;  %v270_v21 = vmul.f32 %v3039_v34, %v242_v11  ;;  %v244_v22 = vld [vmem:[%s3018_s7 + $0x40] sm:$0xff] }
  0x14   : > { %v292_v49 = vadd.f32 %v3044_v35, %v266_v38  ;;  %v293_v50 = vadd.f32 %v3044_v35, %v267_v39  ;;  %v294_v51 = vadd.f32 %v3044_v35, %v268_v45  ;;  %v245_v23 = vld [vmem:[%s3018_s7 + $0x48] sm:$0x3]  ;;  %v272_v28 = vmul.f32 %v3039_v34, %v244_v22  ;;  %v246_v29 = vld [vmem:[%s3018_s7 + $0x50] sm:$0xff]  ;;  %v247_v33 = vld [vmem:[%s3018_s7 + $0x58] sm:$0x3] }
  0x15   : > { %2550 = vmatpush3.bf16.msra.mxu1 %v2547_v26  ;;  %v295_v52 = vadd.f32 %v3044_v35, %v269_v46  ;;  %v3151_v30 = vpack.c.bf16 %v1850_v16, %v1849_v15  ;;  %v296_v31 = vadd.f32 %v3044_v35, %v270_v21  ;;  %v273_v32 = vmul.f32 %v3039_v34, %v245_v23  ;;  %v249_v43 = vld [vmem:[%s3018_s7 + $0x68] sm:$0x3]  ;;  %v375_v45 = vld [vmem:[%s3793_s3 + $0x10] sm:$0xff]  ;;  %v376_v46 = vld [vmem:[%s3793_s3 + $0x18] sm:$0xff] }
  0x16   : > { %2678 = vmatpush3.bf16.msra.mxu0 %v2675_v27  ;;  %2552 = vmatprep.subr.bf16.mxu1 %v2551_v37  ;;  %v3082_v57 = vmax.f32 %v292_v49, 0.0  ;;  %v313_v58 = vmax.f32 %v293_v50, 0.0  ;;  %v3093_v63 = vmax.f32 %v294_v51, 0.0  ;;  %v271_v27 = vmul.f32 %v3039_v34, %v243_v17  ;;  %v1851_v50 = vld [vmem:[%s3793_s3 + $0x290] sm:$0xff]  ;;  %v1852_v55 = vld [vmem:[%s3793_s3 + $0x298] sm:$0xff]  ;;  %v377_v56 = vld [vmem:[%s3793_s3 + $0x20] sm:$0xff] }
  0x17   : > { %2680 = vmatprep.subr.bf16.mxu0 %v2679_v42  ;;  %v315_v4 = vmax.f32 %v295_v52, 0.0  ;;  %v298_v40 = vadd.f32 %v3044_v35, %v272_v28  ;;  %v275_v41 = vmul.f32 %v3039_v34, %v247_v33  ;;  %v3170_v47 = vmax.f32 %v296_v31, 0.0  ;;  %v250_v6 = vld [vmem:[%s3018_s7 + $0x70] sm:$0xff]  ;;  %v252_v22 = vld [vmem:[%s3018_s7 + $0x80] sm:$0xff]  ;;  %v253_v31 = vld [vmem:[%s3018_s7 + $0x88] sm:$0x3] }
  0x18   : > { %v3104_v2 = vsel %vm333_vm0, %v3082_v57, 0.0  ;;  %v3108_v3 = vsel %vm340_vm1, %v313_v58, 0.0  ;;  %v3136_v20 = vsel %vm333_vm0, %v3093_v63, 0.0  ;;  %v297_v39 = vadd.f32 %v3044_v35, %v271_v27  ;;  %v378_v58 = vld [vmem:[%s3793_s3 + $0x28] sm:$0xff]  ;;  %v1857_v36 = vld [vmem:[%s3793_s3 + $0x2c0] sm:$0xff]  ;;  %v1918_v25 = vld [vmem:[%s3793_s3 + $0x470] sm:$0xff] }
  0x19   : > { %2554 = vmatpush3.bf16.msra.mxu1 %v2551_v37  ;;  %v409_v9 = vrot.slane %v3104_v2, 1  ;;  %v410_v10 = vrot.slane %v3108_v3, 1  ;;  %v3146_v26 = vsel %vm340_vm1, %v315_v4, 0.0  ;;  %v274_v37 = vmul.f32 %v3039_v34, %v246_v29 }
  0x1a   : > { %2682 = vmatpush3.bf16.msra.mxu0 %v2679_v42  ;;  %2556 = vmatprep.subr.bf16.mxu1 %v2555_v53  ;;  %v412_v38 = vrot.slane %v3136_v20, 1  ;;  %v248_v42 = vld [vmem:[%s3018_s7 + $0x60] sm:$0xff]  ;;  %v413_v44 = vrot.slane %v3146_v26, 1  ;;  %v299_v48 = vadd.f32 %v3044_v35, %v273_v32  ;;  %v317_v51 = vmax.f32 %v297_v39, 0.0 }
  0x1b   : > { %2684 = vmatprep.subr.bf16.mxu0 %v2683_v59  ;;  %v3131_v19 = vsel %vm405_vm2, %v409_v9, %v410_v10  ;;  %v300_v49 = vadd.f32 %v3044_v35, %v274_v37  ;;  %v3177_v52 = vmax.f32 %v298_v40, 0.0  ;;  %v276_v54 = vmul.f32 %v3039_v34, %v248_v42  ;;  %v1854_v42 = vld [vmem:[%s3793_s3 + $0x2a8] sm:$0xff] }
  0x1c   : > { %2347 = vmatprep.mubr.f32.mxu0 %v3131_v19  ;;  %v319_v60 = vmax.f32 %v299_v48, 0.0  ;;  %v277_v62 = vmul.f32 %v3039_v34, %v249_v43  ;;  %v3199_v0 = vpack.c.bf16 %v376_v46, %v375_v45  ;;  %v3203_v1 = vsel %vm340_vm1, %v317_v51, 0.0 }
  0x1d   : > { %2558 = vmatpush3.bf16.msra.mxu1 %v2555_v53  ;;  %v301_v53 = vadd.f32 %v3044_v35, %v275_v41  ;;  %v3195_v61 = vmax.f32 %v300_v49, 0.0  ;;  %v3208_v4 = vsel %vm333_vm0, %v3177_v52, 0.0  ;;  %v416_v10 = vrot.slane %v3203_v1, 1  ;;  %v1853_v41 = vld [vmem:[%s3793_s3 + $0x2a0] sm:$0xff] }
  0x1e   : > { %2686 = vmatpush3.bf16.msra.mxu0 %v2683_v59  ;;  %2560 = vmatprep.subr.bf16.mxu1 %v2559_v12  ;;  %v3193_v59 = vsel %vm333_vm0, %v3170_v47, 0.0  ;;  %v3216_v11 = vsel %vm340_vm1, %v319_v60, 0.0  ;;  %v2699_v15 = vpack.c.bf16 %v1852_v55, %v1851_v50  ;;  %v3224_v16 = vpack.c.bf16 %v378_v58, %v377_v56  ;;  %v379_v55 = vld [vmem:[%s3793_s3 + $0x30] sm:$0xff]  ;;  %v380_v56 = vld [vmem:[%s3793_s3 + $0x38] sm:$0xff] }
  0x1f   : > { %2688 = vmatprep.subr.bf16.mxu0 %v2687_v13  ;;  %v321_v5 = vmax.f32 %v301_v53, 0.0  ;;  %v415_v9 = vrot.slane %v3193_v59, 1  ;;  %v302_v21 = vadd.f32 %v3044_v35, %v276_v54  ;;  %v3234_v23 = vsel %vm405_vm2, %v412_v38, %v413_v44  ;;  %v1855_v58 = vld [vmem:[%s3793_s3 + $0x2b0] sm:$0xff] }
  0x20   : > { %v418_v27 = vrot.slane %v3208_v4, 1  ;;  %v419_v28 = vrot.slane %v3216_v11, 1  ;;  %v303_v29 = vadd.f32 %v3044_v35, %v277_v62  ;;  %v281_v46 = vmul.f32 %v3039_v34, %v253_v31 }
  0x21   : > { %2562 = vmatpush3.bf16.msra.mxu1 %v2559_v12  ;;  %v3221_v12 = vsel %vm333_vm0, %v3195_v61, 0.0  ;;  %v3228_v17 = vsel %vm340_vm1, %v321_v5, 0.0  ;;  %v3243_v33 = vmax.f32 %v302_v21, 0.0  ;;  %v3249_v38 = vsel %vm405_vm2, %v415_v9, %v416_v10 }
  0x22   : > { %2690 = vmatpush3.bf16.msra.mxu0 %v2687_v13  ;;  %2564 = vmatprep.subr.bf16.mxu1 %v3119_v14  ;;  %v251_v13 = vld [vmem:[%s3018_s7 + $0x78] sm:$0x3]  ;;  %v421_v32 = vrot.slane %v3221_v12, 1  ;;  %v422_v39 = vrot.slane %v3228_v17, 1  ;;  %v323_v40 = vmax.f32 %v303_v29, 0.0  ;;  %v307_v53 = vadd.f32 %v3044_v35, %v281_v46  ;;  %v381_v29 = vld [vmem:[%s3793_s3 + $0x40] sm:$0xff]  ;;  %s231_s7 = scalar_lea.vmem %s3794_s4, %s1922_s17 }
  0x23   : > { %2692 = vmatprep.subr.bf16.mxu0 %v3128_v18  ;;  %v279_v37 = vmul.f32 %v3039_v34, %v251_v13  ;;  %v3263_v43 = vsel %vm333_vm0, %v3243_v33, 0.0  ;;  %v2703_v54 = vpack.c.bf16 %v1854_v42, %v1853_v41  ;;  %v2579_v21 = vpack.c.bf16 %v380_v56, %v379_v55  ;;  %v384_v42 = vld [vmem:[%s3793_s3 + $0x58] sm:$0xff]  ;;  %v387_v55 = vld [vmem:[%s3793_s3 + $0x70] sm:$0xff] }
  0x24   : > { %v3275_v48 = vsel %vm340_vm1, %v323_v40, 0.0  ;;  %v424_v49 = vrot.slane %v3263_v43, 1  ;;  %v327_v5 = vmax.f32 %v307_v53, 0.0  ;;  %v388_v56 = vld [vmem:[%s3793_s3 + $0x78] sm:$0xff] }
  0x25   : > { %2566 = vmatpush3.bf16.msra.mxu1 %v3119_v14  ;;  %v278_v14 = vmul.f32 %v3039_v34, %v250_v6  ;;  %v305_v45 = vadd.f32 %v3044_v35, %v279_v37  ;;  %v3314_v6 = vsel %vm405_vm2, %v421_v32, %v422_v39  ;;  %v1858_v32 = vld [vmem:[%s3793_s3 + $0x2c8] sm:$0xff]  ;;  %v669_v37 = vrot.slane %v3104_v2, 2  ;;  %v1859_v2 = vld [vmem:[%s3793_s3 + $0x2d0] sm:$0xff] }
  0x26   : > { %2694 = vmatpush3.bf16.msra.mxu0 %v3128_v18  ;;  %2568 = vmatprep.subr.bf16.mxu1 %v3141_v24  ;;  %v280_v18 = vmul.f32 %v3039_v34, %v252_v22  ;;  %v425_v34 = vrot.slane %v3275_v48, 1  ;;  %v3329_v22 = vsel %vm340_vm1, %v327_v5, 0.0  ;;  %v670_v39 = vrot.slane %v3108_v3, 2  ;;  %v1860_v3 = vld [vmem:[%s3793_s3 + $0x2d8] sm:$0xff] }
  0x27   : > { %2696 = vmatprep.subr.bf16.mxu0 %v3151_v30  ;;  %v304_v44 = vadd.f32 %v3044_v35, %v278_v14  ;;  %v325_v51 = vmax.f32 %v305_v45, 0.0  ;;  %v961_v31 = vrot.slane %v3329_v22, 1  ;;  %v2711_v41 = vpack.c.bf16 %v1858_v32, %v1857_v36  ;;  %v1795_v32 = vld [vmem:[%s3793_s3 + $0x110] sm:$0xff] }
  0x28   : > { %2172 = vmatmul.mubr.f32.vlgmr.msra.gmra.mrb[0].mxu1 %v3131_v19  ;;  %v3271_v19 = vsel %vm405_vm2, %v418_v27, %v419_v28  ;;  %v306_v50 = vadd.f32 %v3044_v35, %v280_v18  ;;  %v1856_v35 = vld [vmem:[%s3793_s3 + $0x2b8] sm:$0xff]  ;;  %v2715_v46 = vpack.c.bf16 %v1860_v3, %v1859_v2  ;;  %v2595_v5 = vpack.c.bf16 %v388_v56, %v387_v55  ;;  %v1799_v55 = vld [vmem:[%s3793_s3 + $0x130] sm:$0xff] }
  0x29   : > { %2570 = vmatpush3.bf16.msra.mxu1 %v3141_v24  ;;  %2348 = vmatmul.mubr.f32.vlgmr.msra.gmra.mrb[0].mxu0 %v3234_v23  ;;  %v3282_v24 = vmax.f32 %v304_v44, 0.0  ;;  %v3309_v62 = vsel %vm340_vm1, %v325_v51, 0.0  ;;  %v2707_v28 = vpack.c.bf16 %v1856_v35, %v1855_v58  ;;  %v3375_v44 = vsel %vm665_vm3, %v669_v37, %v670_v39  ;;  %v1862_v51 = vld [vmem:[%s3793_s3 + $0x2e8] sm:$0xff]  ;;  %v1863_v58 = vld [vmem:[%s3793_s3 + $0x2f0] sm:$0xff]  ;;  %v1864_v35 = vld [vmem:[%s3793_s3 + $0x2f8] sm:$0xff] }
  0x2a   : > { %2698 = vmatpush3.bf16.msra.mxu0 %v3151_v30  ;;  %2572 = vmatprep.subr.bf16.mxu1 %v3199_v0  ;;  %v3292_v30 = vmax.f32 %v306_v50, 0.0  ;;  %v428_v10 = vrot.slane %v3309_v62, 1  ;;  %v386_v50 = vld [vmem:[%s3793_s3 + $0x68] sm:$0xff]  ;;  %v1796_v37 = vld [vmem:[%s3793_s3 + $0x118] sm:$0xff]  ;;  %v1867_v39 = vld [vmem:[%s3793_s3 + $0x310] sm:$0xff]  ;;  %v679_v2 = vrot.slane %v3216_v11, 2 }
  0x2b   : > { %2700 = vmatprep.subr.bf16.mxu0 %v2699_v15  ;;  %2174 = vmatprep.mubr.f32.mxu1 %v3234_v23  ;;  %v3305_v60 = vsel %vm333_vm0, %v3282_v24, 0.0 }
  0x2c   : > { %2350 = vmatprep.mubr.f32.mxu0 %v3249_v38  ;;  %2175 = vmatmul.mubr.f32.gmra.mrb[2].mxu1 %v3249_v38  ;;  %v427_v9 = vrot.slane %v3305_v60, 1  ;;  %v3321_v13 = vsel %vm333_vm0, %v3292_v30, 0.0  ;;  %v687_v56 = vrot.slane %v3305_v60, 2  ;;  %v1802_v60 = vld [vmem:[%s3793_s3 + $0x148] sm:$0xff] }
  0x2d   : > { %2574 = vmatpush3.bf16.msra.mxu1 %v3199_v0  ;;  %2351 = vmatmul.mubr.f32.gmra.mrb[2].mxu0 %v3271_v19  ;;  %v3325_v0 = vsel %vm405_vm2, %v424_v49, %v425_v34  ;;  %v960_v27 = vrot.slane %v3321_v13, 1  ;;  %v385_v49 = vld [vmem:[%s3793_s3 + $0x60] sm:$0xff] }
  0x2e   : > { %2702 = vmatpush3.bf16.msra.mxu0 %v2699_v15  ;;  %2576 = vmatprep.subr.bf16.mxu1 %v3224_v16  ;;  %v382_v15 = vld [vmem:[%s3793_s3 + $0x48] sm:$0xff]  ;;  %v3351_v14 = vsel %vm405_vm2, %v427_v9, %v428_v10  ;;  %v1861_v34 = vld [vmem:[%s3793_s3 + $0x2e0] sm:$0xff]  ;;  %v2591_v53 = vpack.c.bf16 %v386_v50, %v385_v49  ;;  %v2723_v9 = vpack.c.bf16 %v1864_v35, %v1863_v58  ;;  %v682_v49 = vrot.slane %v3228_v17, 2  ;;  %v1871_v17 = vld [vmem:[%s3793_s3 + $0x330] sm:$0xff] }
  0x2f   : > { %2704 = vmatprep.subr.bf16.mxu0 %v2703_v54  ;;  %2177 = vmatprep.mubr.f32.mxu1 %v3271_v19  ;;  %v2583_v40 = vpack.c.bf16 %v382_v15, %v381_v29  ;;  %v3356_v18 = vsel %vm405_vm2, %v960_v27, %v961_v31  ;;  %v1793_v10 = vld [vmem:[%s3793_s3 + $0x100] sm:$0xff]  ;;  %v672_v29 = vrot.slane %v3136_v20, 2  ;;  %v673_v15 = vrot.slane %v3146_v26, 2  ;;  %v1868_v20 = vld [vmem:[%s3793_s3 + $0x318] sm:$0xff] }
  0x30   : > { %2353 = vmatprep.mubr.f32.mxu0 %v3314_v6  ;;  %2178 = vmatmul.mubr.f32.gmra.mrb[4].mxu1 %v3314_v6  ;;  %v1865_v27 = vld [vmem:[%s3793_s3 + $0x300] sm:$0xff]  ;;  %v675_v26 = vrot.slane %v3193_v59, 2  ;;  %v2731_v3 = vpack.c.bf16 %v1868_v20, %v1867_v39  ;;  %v1798_v59 = vld [vmem:[%s3793_s3 + $0x128] sm:$0xff]  ;;  %v688_v58 = vrot.slane %v3309_v62, 2  ;;  %v1876_v39 = vld [vmem:[%s3793_s3 + $0x358] sm:$0xff] }
  0x31   : > { %2578 = vmatpush3.bf16.msra.mxu1 %v3224_v16  ;;  %2354 = vmatmul.mubr.f32.gmra.mrb[4].mxu0 %v3325_v0  ;;  %v383_v16 = vld [vmem:[%s3793_s3 + $0x50] sm:$0xff]  ;;  %v1873_v62 = vld [vmem:[%s3793_s3 + $0x340] sm:$0xff] }
  0x32   : > { %2706 = vmatpush3.bf16.msra.mxu0 %v2703_v54  ;;  %2580 = vmatprep.subr.bf16.mxu1 %v2579_v21  ;;  %v2587_v45 = vpack.c.bf16 %v384_v42, %v383_v16  ;;  %v2719_v54 = vpack.c.bf16 %v1862_v51, %v1861_v34  ;;  %v2603_v16 = vpack.c.bf16 %v1796_v37, %v1795_v32  ;;  %v678_v42 = vrot.slane %v3208_v4, 2  ;;  %v1870_v4 = vld [vmem:[%s3793_s3 + $0x328] sm:$0xff]  ;;  %v1875_v37 = vld [vmem:[%s3793_s3 + $0x350] sm:$0xff] }
  0x33   : > { %2708 = vmatprep.subr.bf16.mxu0 %v2707_v28  ;;  %2180 = vmatprep.mubr.f32.mxu1 %v3325_v0  ;;  %v684_v51 = vrot.slane %v3263_v43, 2  ;;  %v1872_v43 = vld [vmem:[%s3793_s3 + $0x338] sm:$0xff]  ;;  %v3528_v32 = vrot.slane %v2921_v7, 2 }
  0x34   : > { %2356 = vmatprep.mubr.f32.mxu0 %v3351_v14  ;;  %2181 = vmatmul.mubr.f32.gmra.mrb[6].mxu1 %v3351_v14  ;;  %v3458_v34 = vsel %vm665_vm3, %v678_v42, %v679_v2  ;;  %v1877_v42 = vld [vmem:[%s3793_s3 + $0x360] sm:$0xff]  ;;  %v1878_v2 = vld [vmem:[%s3793_s3 + $0x368] sm:$0xff] }
  0x35   : > { %2582 = vmatpush3.bf16.msra.mxu1 %v2579_v21  ;;  %2357 = vmatmul.mubr.f32.gmra.mrb[6].mxu0 %v3356_v18  ;;  %v1794_v21 = vld [vmem:[%s3793_s3 + $0x108] sm:$0xff] }
  0x36   : > { %2710 = vmatpush3.bf16.msra.mxu0 %v2707_v28  ;;  %2584 = vmatprep.subr.bf16.mxu1 %v2583_v40  ;;  %v1866_v28 = vld [vmem:[%s3793_s3 + $0x308] sm:$0xff]  ;;  %v2599_v31 = vpack.c.bf16 %v1794_v21, %v1793_v10  ;;  %v1095_v10 = vrot.slane %v3329_v22, 2  ;;  %v2739_v21 = vpack.c.bf16 %v1872_v43, %v1871_v17  ;;  %v3513_v22 = vsel %vm665_vm3, %v687_v56, %v688_v58  ;;  %v1811_v43 = vld [vmem:[%s3793_s3 + $0x190] sm:$0xff]  ;;  %v1812_v56 = vld [vmem:[%s3793_s3 + $0x198] sm:$0xff] }
  0x37   : > { %2712 = vmatprep.subr.bf16.mxu0 %v2711_v41  ;;  %2215 = vmatprep.mubr.f32.mxu1 %v2921_v7  ;;  %v2727_v36 = vpack.c.bf16 %v1866_v28, %v1865_v27  ;;  %v1801_v27 = vld [vmem:[%s3793_s3 + $0x140] sm:$0xff]  ;;  %v1890_v58 = vld [vmem:[%s3793_s3 + $0x390] sm:$0xff] }
  0x38   : > { %2391 = vmatprep.mubr.f32.mxu0 %v3375_v44  ;;  %v2615_v28 = vpack.c.bf16 %v1802_v60, %v1801_v27  ;;  %v1814_v27 = vld [vmem:[%s3793_s3 + $0x1a8] sm:$0xff]  ;;  %v1892_v60 = vld [vmem:[%s3793_s3 + $0x3a0] sm:$0xff] }
  0x39   : > { %2586 = vmatpush3.bf16.msra.mxu1 %v2583_v40  ;;  %v676_v40 = vrot.slane %v3203_v1, 2  ;;  %v1869_v1 = vld [vmem:[%s3793_s3 + $0x320] sm:$0xff] }
  0x3a   : > { %2714 = vmatpush3.bf16.msra.mxu0 %v2711_v41  ;;  %2588 = vmatprep.subr.bf16.mxu1 %v2587_v45  ;;  %v3432_v41 = vsel %vm665_vm3, %v672_v29, %v673_v15 }
  0x3b   : > { %2716 = vmatprep.subr.bf16.mxu0 %v2715_v46  ;;  %v3453_v11 = vsel %vm665_vm3, %v675_v26, %v676_v40  ;;  %v2747_v26 = vpack.c.bf16 %v1876_v39, %v1875_v37  ;;  %v1805_v40 = vld [vmem:[%s3793_s3 + $0x160] sm:$0xff] }
  0x3d   : > { %2590 = vmatpush3.bf16.msra.mxu1 %v2587_v45  ;;  %v1797_v45 = vld [vmem:[%s3793_s3 + $0x120] sm:$0xff] }
  0x3e   : > { %2718 = vmatpush3.bf16.msra.mxu0 %v2715_v46  ;;  %2592 = vmatprep.subr.bf16.mxu1 %v2591_v53  ;;  %v681_v46 = vrot.slane %v3221_v12, 2  ;;  %v2607_v50 = vpack.c.bf16 %v1798_v59, %v1797_v45  ;;  %v1800_v12 = vld [vmem:[%s3793_s3 + $0x138] sm:$0xff]  ;;  %v2751_v45 = vpack.c.bf16 %v1878_v2, %v1877_v42  ;;  %v1807_v59 = vld [vmem:[%s3793_s3 + $0x170] sm:$0xff] }
  0x3f   : > { %2720 = vmatprep.subr.bf16.mxu0 %v2719_v54  ;;  %v2611_v35 = vpack.c.bf16 %v1800_v12, %v1799_v55  ;;  %v1889_v55 = vld [vmem:[%s3793_s3 + $0x388] sm:$0xff] }
  0x41   : > { %2594 = vmatpush3.bf16.msra.mxu1 %v2591_v53  ;;  %v685_v53 = vrot.slane %v3275_v48, 2  ;;  %v3483_v48 = vsel %vm665_vm3, %v681_v46, %v682_v49  ;;  %v1880_v46 = vld [vmem:[%s3793_s3 + $0x378] sm:$0xff] }
  0x42   : > { %2722 = vmatpush3.bf16.msra.mxu0 %v2719_v54  ;;  %2596 = vmatprep.subr.bf16.mxu1 %v2595_v5  ;;  %v2735_v54 = vpack.c.bf16 %v1870_v4, %v1869_v1  ;;  %v1808_v1 = vld [vmem:[%s3793_s3 + $0x178] sm:$0xff]  ;;  %v1879_v4 = vld [vmem:[%s3793_s3 + $0x370] sm:$0xff] }
  0x43   : > { %2724 = vmatprep.subr.bf16.mxu0 %v2723_v9  ;;  %v2627_v49 = vpack.c.bf16 %v1808_v1, %v1807_v59  ;;  %v1898_v59 = vld [vmem:[%s3793_s3 + $0x3d0] sm:$0xff]  ;;  %v1899_v1 = vld [vmem:[%s3793_s3 + $0x3d8] sm:$0xff] }
  0x45   : > { %2598 = vmatpush3.bf16.msra.mxu1 %v2595_v5  ;;  %v3488_v5 = vsel %vm665_vm3, %v684_v51, %v685_v53  ;;  %v1809_v51 = vld [vmem:[%s3793_s3 + $0x180] sm:$0xff]  ;;  %v1810_v53 = vld [vmem:[%s3793_s3 + $0x188] sm:$0xff] }
  0x46   : > { %2726 = vmatpush3.bf16.msra.mxu0 %v2723_v9  ;;  %2600 = vmatprep.subr.bf16.mxu1 %v2599_v31  ;;  %v1094_v9 = vrot.slane %v3321_v13, 2  ;;  %v1874_v13 = vld [vmem:[%s3793_s3 + $0x348] sm:$0xff]  ;;  %v2631_v12 = vpack.c.bf16 %v1810_v53, %v1809_v51 }
  0x47   : > { %2728 = vmatprep.subr.bf16.mxu0 %v2727_v36  ;;  %v2743_v15 = vpack.c.bf16 %v1874_v13, %v1873_v62  ;;  %v1893_v62 = vld [vmem:[%s3793_s3 + $0x3a8] sm:$0xff] }
  0x48   : > { %2216 = vmatmul.mubr.msk.f32.vlgmr.msra.gmra.mrb[0].mxu1 %vm333_vm0, %v3082_v57  ;;  %v3516_v29 = vsel %vm665_vm3, %v1094_v9, %v1095_v10  ;;  %v2635_v9 = vpack.c.bf16 %v1812_v56, %v1811_v43  ;;  %v1901_v51 = vld [vmem:[%s3793_s3 + $0x3e8] sm:$0xff]  ;;  %v1904_v56 = vld [vmem:[%s3793_s3 + $0x400] sm:$0xff] }
  0x49   : > { %2602 = vmatpush3.bf16.msra.mxu1 %v2599_v31  ;;  %2392 = vmatmul.mubr.f32.vlgmr.msra.gmra.mrb[0].mxu0 %v3432_v41  ;;  %v1803_v31 = vld [vmem:[%s3793_s3 + $0x150] sm:$0xff] }
  0x4a   : > { %2730 = vmatpush3.bf16.msra.mxu0 %v2727_v36  ;;  %2604 = vmatprep.subr.bf16.mxu1 %v2603_v16  ;;  %v1804_v36 = vld [vmem:[%s3793_s3 + $0x158] sm:$0xff] }
  0x4b   : > { %2732 = vmatprep.subr.bf16.mxu0 %v2731_v3  ;;  %2218 = vmatprep.mubr.msk.f32.mxu1 %vm333_vm0, %v3093_v63  ;;  %v2619_v20 = vpack.c.bf16 %v1804_v36, %v1803_v31  ;;  %v1894_v31 = vld [vmem:[%s3793_s3 + $0x3b0] sm:$0xff]  ;;  %v1895_v36 = vld [vmem:[%s3793_s3 + $0x3b8] sm:$0xff] }
  0x4c   : > { %2394 = vmatprep.mubr.f32.mxu0 %v3453_v11  ;;  %2219 = vmatmul.mubr.msk.f32.gmra.mrb[2].mxu1 %vm333_vm0, %v3170_v47  ;;  %v2771_v39 = vpack.c.bf16 %v1895_v36, %v1894_v31 }
  0x4d   : > { %2606 = vmatpush3.bf16.msra.mxu1 %v2603_v16  ;;  %2395 = vmatmul.mubr.f32.gmra.mrb[2].mxu0 %v3458_v34  ;;  %v1806_v16 = vld [vmem:[%s3793_s3 + $0x168] sm:$0xff] }
  0x4e   : > { %2734 = vmatpush3.bf16.msra.mxu0 %v2731_v3  ;;  %2608 = vmatprep.subr.bf16.mxu1 %v2607_v50  ;;  %v2623_v3 = vpack.c.bf16 %v1806_v16, %v1805_v40  ;;  %v1896_v40 = vld [vmem:[%s3793_s3 + $0x3c0] sm:$0xff]  ;;  %v1897_v16 = vld [vmem:[%s3793_s3 + $0x3c8] sm:$0xff] }
  0x4f   : > { %2736 = vmatprep.subr.bf16.mxu0 %v2735_v54  ;;  %2221 = vmatprep.mubr.msk.f32.mxu1 %vm333_vm0, %v3177_v52  ;;  %v2775_v2 = vpack.c.bf16 %v1897_v16, %v1896_v40 }
  0x50   : > { %2397 = vmatprep.mubr.f32.mxu0 %v3483_v48  ;;  %2222 = vmatmul.mubr.msk.f32.gmra.mrb[4].mxu1 %vm333_vm0, %v3195_v61 }
  0x51   : > { %2610 = vmatpush3.bf16.msra.mxu1 %v2607_v50  ;;  %2398 = vmatmul.mubr.f32.gmra.mrb[4].mxu0 %v3488_v5  ;;  %v2755_v50 = vpack.c.bf16 %v1880_v46, %v1879_v4  ;;  %v2779_v46 = vpack.c.bf16 %v1899_v1, %v1898_v59 }
  0x52   : > { %2738 = vmatpush3.bf16.msra.mxu0 %v2735_v54  ;;  %2612 = vmatprep.subr.bf16.mxu1 %v2611_v35  ;;  %v1888_v54 = vld [vmem:[%s3793_s3 + $0x380] sm:$0xff] }
  0x53   : > { %2740 = vmatprep.subr.bf16.mxu0 %v2739_v21  ;;  %2224 = vmatprep.mubr.msk.f32.mxu1 %vm333_vm0, %v3243_v33  ;;  %v2759_v17 = vpack.c.bf16 %v1889_v55, %v1888_v54  ;;  %v1824_v55 = vld [vmem:[%s3793_s3 + $0x1f8] sm:$0xff] }
  0x54   : > { %2400 = vmatprep.mubr.f32.mxu0 %v3513_v22  ;;  %2225 = vmatmul.mubr.msk.f32.gmra.mrb[6].mxu1 %vm333_vm0, %v3282_v24 }
  0x55   : > { %2614 = vmatpush3.bf16.msra.mxu1 %v2611_v35  ;;  %2401 = vmatmul.mubr.f32.gmra.mrb[6].mxu0 %v3516_v29  ;;  %v1891_v35 = vld [vmem:[%s3793_s3 + $0x398] sm:$0xff] }
  0x56   : > { %2742 = vmatpush3.bf16.msra.mxu0 %v2739_v21  ;;  %2616 = vmatprep.subr.bf16.mxu1 %v2615_v28  ;;  %v2763_v10 = vpack.c.bf16 %v1891_v35, %v1890_v58  ;;  %v1813_v21 = vld [vmem:[%s3793_s3 + $0x1a0] sm:$0xff]  ;;  %v1905_v58 = vld [vmem:[%s3793_s3 + $0x408] sm:$0xff] }
  0x57   : > { %2744 = vmatprep.subr.bf16.mxu0 %v2743_v15  ;;  %2259 = vmatprep.mubr.f32.mxu1 %v3528_v32  ;;  %v2639_v13 = vpack.c.bf16 %v1814_v27, %v1813_v21  ;;  %v2791_v35 = vpack.c.bf16 %v1905_v58, %v1904_v56  ;;  %v1908_v27 = vld [vmem:[%s3793_s3 + $0x420] sm:$0xff] }
  0x58   : > { %2435 = vmatprep.mubr.msk.f32.mxu0 %vm333_vm0, %v3093_v63 }
  0x59   : > { %2618 = vmatpush3.bf16.msra.mxu1 %v2615_v28  ;;  %v2767_v28 = vpack.c.bf16 %v1893_v62, %v1892_v60  ;;  %v1909_v60 = vld [vmem:[%s3793_s3 + $0x428] sm:$0xff]  ;;  %v1910_v62 = vld [vmem:[%s3793_s3 + $0x430] sm:$0xff] }
  0x5a   : > { %2746 = vmatpush3.bf16.msra.mxu0 %v2743_v15  ;;  %2620 = vmatprep.subr.bf16.mxu1 %v2619_v20  ;;  %v1816_v15 = vld [vmem:[%s3793_s3 + $0x1b8] sm:$0xff] }
  0x5b   : > { %2748 = vmatprep.subr.bf16.mxu0 %v2747_v26 }
  0x5d   : > { %2622 = vmatpush3.bf16.msra.mxu1 %v2619_v20  ;;  %v1817_v20 = vld [vmem:[%s3793_s3 + $0x1c0] sm:$0xff] }
  0x5e   : > { %2750 = vmatpush3.bf16.msra.mxu0 %v2747_v26  ;;  %2624 = vmatprep.subr.bf16.mxu1 %v2623_v3  ;;  %v1818_v26 = vld [vmem:[%s3793_s3 + $0x1c8] sm:$0xff] }
  0x5f   : > { %2752 = vmatprep.subr.bf16.mxu0 %v2751_v45  ;;  %v2647_v42 = vpack.c.bf16 %v1818_v26, %v1817_v20 }
  0x61   : > { %2626 = vmatpush3.bf16.msra.mxu1 %v2623_v3  ;;  %v1819_v3 = vld [vmem:[%s3793_s3 + $0x1d0] sm:$0xff] }
  0x62   : > { %2754 = vmatpush3.bf16.msra.mxu0 %v2751_v45  ;;  %2628 = vmatprep.subr.bf16.mxu1 %v2627_v49  ;;  %v1820_v45 = vld [vmem:[%s3793_s3 + $0x1d8] sm:$0xff] }
  0x63   : > { %2756 = vmatprep.subr.bf16.mxu0 %v2755_v50  ;;  %v2651_v4 = vpack.c.bf16 %v1820_v45, %v1819_v3 }
  0x65   : > { %2630 = vmatpush3.bf16.msra.mxu1 %v2627_v49  ;;  %v1821_v49 = vld [vmem:[%s3793_s3 + $0x1e0] sm:$0xff] }
  0x66   : > { %2758 = vmatpush3.bf16.msra.mxu0 %v2755_v50  ;;  %2632 = vmatprep.subr.bf16.mxu1 %v2631_v12  ;;  %v1822_v50 = vld [vmem:[%s3793_s3 + $0x1e8] sm:$0xff] }
  0x67   : > { %2760 = vmatprep.subr.bf16.mxu0 %v2759_v17  ;;  %v2655_v53 = vpack.c.bf16 %v1822_v50, %v1821_v49 }
  0x68   : > { %2260 = vmatmul.mubr.f32.vlgmr.msra.gmra.mrb[0].mxu1 %v3375_v44  ;;  %v1815_v44 = vld [vmem:[%s3793_s3 + $0x1b0] sm:$0xff] }
  0x69   : > { %2634 = vmatpush3.bf16.msra.mxu1 %v2631_v12  ;;  %2436 = vmatmul.mubr.msk.f32.vlgmr.msra.gmra.mrb[0].mxu0 %vm333_vm0, %v3170_v47  ;;  %v2643_v37 = vpack.c.bf16 %v1816_v15, %v1815_v44  ;;  %v1902_v12 = vld [vmem:[%s3793_s3 + $0x3f0] sm:$0xff] }
  0x6a   : > { %2762 = vmatpush3.bf16.msra.mxu0 %v2759_v17  ;;  %2636 = vmatprep.subr.bf16.mxu1 %v2635_v9 }
  0x6b   : > { %2764 = vmatprep.subr.bf16.mxu0 %v2763_v10  ;;  %2262 = vmatprep.mubr.f32.mxu1 %v3432_v41 }
  0x6c   : > { %2438 = vmatprep.mubr.msk.f32.mxu0 %vm333_vm0, %v3177_v52  ;;  %2263 = vmatmul.mubr.f32.gmra.mrb[2].mxu1 %v3453_v11 }
  0x6d   : > { %2638 = vmatpush3.bf16.msra.mxu1 %v2635_v9  ;;  %2439 = vmatmul.mubr.msk.f32.gmra.mrb[2].mxu0 %vm333_vm0, %v3195_v61  ;;  %v1906_v9 = vld [vmem:[%s3793_s3 + $0x410] sm:$0xff] }
  0x6e   : > { %2766 = vmatpush3.bf16.msra.mxu0 %v2763_v10  ;;  %2640 = vmatprep.subr.bf16.mxu1 %v2639_v13  ;;  %v1907_v10 = vld [vmem:[%s3793_s3 + $0x418] sm:$0xff] }
  0x6f   : > { %2768 = vmatprep.subr.bf16.mxu0 %v2767_v28  ;;  %2265 = vmatprep.mubr.f32.mxu1 %v3458_v34  ;;  %v2795_v21 = vpack.c.bf16 %v1907_v10, %v1906_v9 }
  0x70   : > { %2441 = vmatprep.mubr.msk.f32.mxu0 %vm333_vm0, %v3243_v33  ;;  %2266 = vmatmul.mubr.f32.gmra.mrb[4].mxu1 %v3483_v48 }
  0x71   : > { %2642 = vmatpush3.bf16.msra.mxu1 %v2639_v13  ;;  %2442 = vmatmul.mubr.msk.f32.gmra.mrb[4].mxu0 %vm333_vm0, %v3282_v24 }
  0x72   : > { %2770 = vmatpush3.bf16.msra.mxu0 %v2767_v28  ;;  %2644 = vmatprep.subr.bf16.mxu1 %v2643_v37 }
  0x73   : > { %2772 = vmatprep.subr.bf16.mxu0 %v2771_v39  ;;  %2268 = vmatprep.mubr.f32.mxu1 %v3488_v5 }
  0x74   : > { %2444 = vmatprep.mubr.msk.f32.mxu0 %vm333_vm0, %v3292_v30  ;;  %2269 = vmatmul.mubr.f32.gmra.mrb[6].mxu1 %v3513_v22 }
  0x75   : > { %2646 = vmatpush3.bf16.msra.mxu1 %v2643_v37  ;;  %2445 = vmatmul.mubr.f32.gmra.mrb[6].mxu0 %v2921_v7  ;;  %v1900_v7 = vld [vmem:[%s3793_s3 + $0x3e0] sm:$0xff] }
  0x76   : > { %2774 = vmatpush3.bf16.msra.mxu0 %v2771_v39  ;;  %2648 = vmatprep.subr.bf16.mxu1 %v2647_v42  ;;  %v2783_v54 = vpack.c.bf16 %v1901_v51, %v1900_v7 }
  0x77   : > { %2776 = vmatprep.subr.bf16.mxu0 %v2775_v2  ;;  %2303 = vmatprep.mubr.msk.f32.mxu1 %vm333_vm0, %v3082_v57  ;;  %v1823_v57 = vld [vmem:[%s3793_s3 + $0x1f0] sm:$0xff] }
  0x78   : > { %2479 = vmatprep.mubr.f32.mxu0 %v3234_v23  ;;  %v1903_v23 = vld [vmem:[%s3793_s3 + $0x3f8] sm:$0xff]  ;;  %v2659_v17 = vpack.c.bf16 %v1824_v55, %v1823_v57 }
  0x79   : > { %2650 = vmatpush3.bf16.msra.mxu1 %v2647_v42  ;;  %v2787_v43 = vpack.c.bf16 %v1903_v23, %v1902_v12 }
  0x7a   : > { %2778 = vmatpush3.bf16.msra.mxu0 %v2775_v2  ;;  %2652 = vmatprep.subr.bf16.mxu1 %v2651_v4 }
  0x7b   : > { %2780 = vmatprep.subr.bf16.mxu0 %v2779_v46 }
  0x7d   : > { %2654 = vmatpush3.bf16.msra.mxu1 %v2651_v4 }
  0x7e   : > { %2782 = vmatpush3.bf16.msra.mxu0 %v2779_v46  ;;  %2656 = vmatprep.subr.bf16.mxu1 %v2655_v53 }
  0x7f   : > { %2784 = vmatprep.subr.bf16.mxu0 %v2783_v54 }
  0x81   : > { %2658 = vmatpush3.bf16.msra.mxu1 %v2655_v53 }
  0x82   : > { %2786 = vmatpush3.bf16.msra.mxu0 %v2783_v54  ;;  %2660 = vmatprep.subr.bf16.mxu1 %v2659_v17 }
  0x83   : > { %2788 = vmatprep.subr.bf16.mxu0 %v2787_v43 }
  0x85   : > { %2662 = vmatpush3.bf16.msra.mxu1 %v2659_v17 }
  0x86   : > { %2790 = vmatpush3.bf16.msra.mxu0 %v2787_v43  ;;  %2823 = vmatprep.subr.bf16.mxu1 %v2791_v35 }
  0x87   : > { %2792 = vmatprep.subr.bf16.mxu0 %v2791_v35 }
  0x88   : > { %2304 = vmatmul.mubr.msk.f32.vlgmr.msra.gmra.mrb[0].mxu1 %vm333_vm0, %v3093_v63  ;;  %v2799_v63 = vpack.c.bf16 %v1909_v60, %v1908_v27 }
  0x89   : > { %2480 = vmatmul.mubr.f32.vlgmr.msra.gmra.mrb[0].mxu0 %v3249_v38  ;;  %2831 = vmatpush3.bf16.msra.mxu1 %v2791_v35  ;;  %v1911_v38 = vld [vmem:[%s3793_s3 + $0x438] sm:$0xff] }
  0x8a   : > { %2794 = vmatpush3.bf16.msra.mxu0 %v2791_v35  ;;  %2306 = vmatprep.mubr.msk.f32.mxu1 %vm333_vm0, %v3170_v47  ;;  %v2803_v47 = vpack.c.bf16 %v1911_v38, %v1910_v62 }
  0x8b   : > { %2482 = vmatprep.mubr.f32.mxu0 %v3271_v19  ;;  %2796 = vmatprep.subr.bf16.mxu0 %v2795_v21  ;;  %v1913_v19 = vld [vmem:[%s3793_s3 + $0x448] sm:$0xff] }
  0x8c   : > { %2307 = vmatmul.mubr.msk.f32.gmra.mrb[2].mxu1 %vm333_vm0, %v3177_v52  ;;  %2824 = vmatprep.subr.bf16.mxu1 %v2795_v21  ;;  %v1912_v52 = vld [vmem:[%s3793_s3 + $0x440] sm:$0xff] }
  0x8d   : > { %2483 = vmatmul.mubr.f32.gmra.mrb[2].mxu0 %v3314_v6  ;;  %2832 = vmatpush3.bf16.msra.mxu1 %v2795_v21  ;;  %v1914_v6 = vld [vmem:[%s3793_s3 + $0x450] sm:$0xff] }
  0x8e   : > { %2798 = vmatpush3.bf16.msra.mxu0 %v2795_v21  ;;  %2309 = vmatprep.mubr.msk.f32.mxu1 %vm333_vm0, %v3195_v61  ;;  %v2807_v61 = vpack.c.bf16 %v1913_v19, %v1912_v52 }
  0x8f   : > { %2485 = vmatprep.mubr.f32.mxu0 %v3325_v0  ;;  %2800 = vmatprep.subr.bf16.mxu0 %v2799_v63  ;;  %v1916_v0 = vld [vmem:[%s3793_s3 + $0x460] sm:$0xff] }
  0x90   : > { %2310 = vmatmul.mubr.msk.f32.gmra.mrb[4].mxu1 %vm333_vm0, %v3243_v33  ;;  %2825 = vmatprep.subr.bf16.mxu1 %v2799_v63  ;;  %v1915_v33 = vld [vmem:[%s3793_s3 + $0x458] sm:$0xff] }
  0x91   : > { %2486 = vmatmul.mubr.f32.gmra.mrb[4].mxu0 %v3351_v14  ;;  %2833 = vmatpush3.bf16.msra.mxu1 %v2799_v63  ;;  %v1917_v14 = vld [vmem:[%s3793_s3 + $0x468] sm:$0xff] }
  0x92   : > { %2802 = vmatpush3.bf16.msra.mxu0 %v2799_v63  ;;  %2312 = vmatprep.mubr.msk.f32.mxu1 %vm333_vm0, %v3282_v24  ;;  %v2811_v24 = vpack.c.bf16 %v1915_v33, %v1914_v6 }
  0x93   : > { %2488 = vmatprep.mubr.f32.mxu0 %v3356_v18  ;;  %2804 = vmatprep.subr.bf16.mxu0 %v2803_v47 }
  0x94   : > { %2313 = vmatmul.mubr.msk.f32.gmra.mrb[6].mxu1 %vm333_vm0, %v3292_v30  ;;  %2826 = vmatprep.subr.bf16.mxu1 %v2803_v47  ;;  %v1919_v30 = vld [vmem:[%s3793_s3 + $0x478] sm:$0xff] }
  0x95   : > { %2489 = vmatmul.mubr.f32.gmra.mrb[6].mxu0 %v2979_v8  ;;  %2834 = vmatpush3.bf16.msra.mxu1 %v2803_v47  ;;  %v2815_v8 = vpack.c.bf16 %v1917_v14, %v1916_v0  ;;  %v2819_v18 = vpack.c.bf16 %v1919_v30, %v1918_v25 }
  0x96   : > { %2806 = vmatpush3.bf16.msra.mxu0 %v2803_v47  ;;  %2827 = vmatprep.subr.bf16.mxu1 %v2807_v61 }
  0x97   : > { %2808 = vmatprep.subr.bf16.mxu0 %v2807_v61  ;;  %2523 = vmatprep.mubr.f32.mxu0 %v3432_v41 }
  0x98   : > { %2529 = vmatprep.mubr.f32.mxu1 %v3488_v5 }
  0x99   : > { %2835 = vmatpush3.bf16.msra.mxu1 %v2807_v61 }
  0x9a   : > { %2810 = vmatpush3.bf16.msra.mxu0 %v2807_v61  ;;  %2828 = vmatprep.subr.bf16.mxu1 %v2811_v24 }
  0x9b   : > { %2812 = vmatprep.subr.bf16.mxu0 %v2811_v24 }
  0x9d   : > { %2836 = vmatpush3.bf16.msra.mxu1 %v2811_v24 }
  0x9e   : > { %2814 = vmatpush3.bf16.msra.mxu0 %v2811_v24  ;;  %2829 = vmatprep.subr.bf16.mxu1 %v2815_v8 }
  0x9f   : > { %2816 = vmatprep.subr.bf16.mxu0 %v2815_v8 }
  0xa1   : > { %2837 = vmatpush3.bf16.msra.mxu1 %v2815_v8 }
  0xa2   : > { %2818 = vmatpush3.bf16.msra.mxu0 %v2815_v8  ;;  %2830 = vmatprep.subr.bf16.mxu1 %v2819_v18 }
  0xa3   : > { %2820 = vmatprep.subr.bf16.mxu0 %v2819_v18 }
  0xa5   : > { %2838 = vmatpush3.bf16.msra.mxu1 %v2819_v18 }
  0xa6   : > { %2822 = vmatpush3.bf16.msra.mxu0 %v2819_v18 }
  0xa8   : > { %2530 = vmatmul.mubr.f32.vlgmr.msra.gmra.mrb[8].mxu1 %v3513_v22 }
  0xa9   : > { %2524 = vmatmul.mubr.f32.vlgmr.msra.gmra.mrb[0].mxu0 %v3453_v11  ;;  %2532 = vmatprep.mubr.f32.mxu1 %v3516_v29 }
  0xaa   : > { %2526 = vmatprep.mubr.f32.mxu0 %v3458_v34 }
  0xac   : > { %2533 = vmatmul.mubr.f32.gmra.mrb[10].mxu1 %v3528_v32 }
  0xad   : > { %2527 = vmatmul.mubr.f32.gmra.mrb[2].mxu0 %v3483_v48 }
 0x15b   : > { %v2305_v41 = vpop.f32.mrb[0].mxu1 }
 0x15c   : > { %v911_v5 = vpop.f32.mrb[1].mxu1 }
 0x15f   : > { %v2308_v13 = vpop.f32.mrb[2].mxu1 }
 0x160   : > { %v921_v28 = vpop.f32.mrb[3].mxu1 }
 0x163   : > { %v2311_v44 = vpop.f32.mrb[4].mxu1 }
 0x164   : > { %v2487_v15 = vpop.f32.mrb[4].mxu0  ;;  %v931_v31 = vpop.f32.mrb[5].mxu1 }
 0x165   : > { %v2843_v36 = vadd.f32 %v2487_v15, %v2311_v44  ;;  %v1467_v22 = vpop.f32.mrb[5].mxu0 }
 0x166   : > { %v2845_v37 = vadd.f32 %v1467_v22, %v931_v31 }
 0x167   : > { %v2314_v11 = vpop.f32.mrb[6].mxu1 }
 0x168   : > { %v2490_v39 = vpop.f32.mrb[6].mxu0  ;;  %v941_v29 = vpop.f32.mrb[7].mxu1 }
 0x169   : > { %v2847_v20 = vadd.f32 %v2490_v39, %v2314_v11  ;;  %v1477_v34 = vpop.f32.mrb[7].mxu0 }
 0x16a   : > { %v2849_v26 = vadd.f32 %v1477_v34, %v941_v29 }
 0x17b   : > { %v2531_v48 = vpop.f32.mrb[8].mxu1 }
 0x17c   : > { %v2525_v32 = vpop.f32.mrb[0].mxu0  ;;  %v2844_v40 = vadd.f32 %v2843_v36, %v2531_v48  ;;  %v1601_v16 = vpop.f32.mrb[9].mxu1 }
 0x17d   : > { %v2839_v42 = vadd.f32 %v2525_v32, %v2305_v41  ;;  %v1581_v2 = vpop.f32.mrb[1].mxu0  ;;  %v2846_v3 = vadd.f32 %v2845_v37, %v1601_v16 }
 0x17e   : > { %1633 = vst [vmem:[%s231_s7 + $0x28] sm:$0xff] %v2844_v40  ;;  %v2840_v45 = vadd.f32 %v1581_v2, %v911_v5  ;;  %v1654_v10 = vmul.f32 %v2844_v40, %v2844_v40 }
 0x17f   : > { %1629 = vst [vmem:[%s231_s7 + $0x8] sm:$0xff] %v2839_v42  ;;  %v1650_v59 = vmul.f32 %v2839_v42, %v2839_v42  ;;  %1632 = vst [vmem:[%s231_s7 + $0x20] sm:$0xff] %v2846_v3  ;;  %v2534_v1 = vpop.f32.mrb[10].mxu1  ;;  %v1653_v58 = vmul.f32 %v2846_v3, %v2846_v3 }
 0x180   : > { %1628 = vst [vmem:[%s231_s7] sm:$0xff] %v2840_v45  ;;  %v1636_v4 = vadd.f32 %v2840_v45, %v2839_v42  ;;  %v1649_v46 = vmul.f32 %v2840_v45, %v2840_v45  ;;  %v2528_v49 = vpop.f32.mrb[2].mxu0  ;;  %v2848_v50 = vadd.f32 %v2847_v20, %v2534_v1  ;;  %v1611_v7 = vpop.f32.mrb[11].mxu1 }
 0x181   : > { %v2841_v51 = vadd.f32 %v2528_v49, %v2308_v13  ;;  %v1591_v53 = vpop.f32.mrb[3].mxu0  ;;  %v2850_v54 = vadd.f32 %v2849_v26, %v1611_v7 }
 0x182   : > { %v1657_v57 = vadd.f32 %v1650_v59, %v1649_v46  ;;  %1635 = vst [vmem:[%s231_s7 + $0x38] sm:$0xff] %v2848_v50  ;;  %v2842_v55 = vadd.f32 %v1591_v53, %v921_v28  ;;  %v1656_v38 = vmul.f32 %v2848_v50, %v2848_v50 }
 0x183   : > { %1631 = vst [vmem:[%s231_s7 + $0x18] sm:$0xff] %v2841_v51  ;;  %1634 = vst [vmem:[%s231_s7 + $0x30] sm:$0xff] %v2850_v54  ;;  %v1652_v17 = vmul.f32 %v2841_v51, %v2841_v51  ;;  %v1655_v63 = vmul.f32 %v2850_v54, %v2850_v54 }
 0x184   : > { %1630 = vst [vmem:[%s231_s7 + $0x10] sm:$0xff] %v2842_v55  ;;  %v1637_v12 = vadd.f32 %v2842_v55, %v1636_v4  ;;  %v1651_v23 = vmul.f32 %v2842_v55, %v2842_v55 }
 0x186   : > { %v1638_v43 = vadd.f32 %v2841_v51, %v1637_v12  ;;  %v1658_v56 = vadd.f32 %v1657_v57, %v1651_v23 }
 0x188   : > { %v1659_v35 = vadd.f32 %v1658_v56, %v1652_v17  ;;  %v1639_v9 = vadd.f32 %v2846_v3, %v1638_v43 }
 0x18a   : > { %v1640_v21 = vadd.f32 %v2844_v40, %v1639_v9  ;;  %v1660_v27 = vadd.f32 %v1659_v35, %v1653_v58 }
 0x18c   : > { %v1641_v60 = vadd.f32 %v2850_v54, %v1640_v21  ;;  %v1661_v62 = vadd.f32 %v1660_v27, %v1654_v10 }
 0x18e   : > { %v1642_v47 = vadd.f32 %v2848_v50, %v1641_v60  ;;  %v1662_v52 = vadd.f32 %v1661_v62, %v1655_v63 }
 0x190   : > { %v1643_v19 = vrot.slane %v1642_v47, 4  ;;  %v1663_v61 = vadd.f32 %v1662_v52, %v1656_v38 }
 0x192   : > { %v1644_v6 = vadd.f32 %v1643_v19, %v1642_v47  ;;  %v1664_v33 = vrot.slane %v1663_v61, 4 }
 0x194   : > { %v1645_v24 = vrot.slane %v1644_v6, 2  ;;  %v1665_v0 = vadd.f32 %v1664_v33, %v1663_v61 }
 0x196   : > { %v1646_v14 = vadd.f32 %v1645_v24, %v1644_v6  ;;  %v1666_v8 = vrot.slane %v1665_v0, 2 }
 0x198   : > { %v1647_v25 = vrot.slane %v1646_v14, 1  ;;  %v1667_v30 = vadd.f32 %v1666_v8, %v1665_v0 }
 0x19a   : > { %v1668_v18 = vrot.slane %v1667_v30, 1  ;;  %v1648_v41 = vadd.f32 %v1647_v25, %v1646_v14 }
 0x19c   : > { %v1669_v5 = vadd.f32 %v1668_v18, %v1667_v30 }
 0x19e   : > { %v1671_v13 = vsel %vm1670_vm4, %v1648_v41, %v1669_v5 }
 0x19f   : > { %1672 = vst [vmem:[%s235_s25] sm:$0x3] %v1671_v13 }
 0x1a0 PF: > { %s16_s18 = sadd.s32 1, %s2919_s18  }
 0x1a1   : > { %p13_p4 = scmp.ge.s32.totalorder %s16_s18, 4  }
 0x1a3   :  { %15 = sbr.rel (!%p13_p4) target bundleno = 1 (0x1), region = 86 }

</bundles_post_ra>
